<compile_context>
chip_gen: v5e
topology: v5e:2x2
jax: 0.10.0
libtpu: 0.0.40
codegen_flags: <defaults>
</compile_context>

<pallas_src>
import functools
import math

import jax
import jax.numpy as jnp
from jax.experimental import pallas as pl
from jax.experimental.pallas import tpu as pltpu


# ------------------------------ tile selection ------------------------------ #

def _pick_tile(dim, target, gran):
    """Largest tile <= target that divides `dim` and is a multiple of `gran`;
    falls back to the full dim (always layout-legal)."""
    if dim <= target:
        return dim
    t = (target // gran) * gran
    while t >= gran:
        if dim % t == 0:
            return t
        t -= gran
    return dim


# ----------------------------- Pallas kernels ------------------------------ #

def _linear_kernel(*refs, activation, fuse_ln, fuse_residual, eps):
    """Tiled y = [LN](x) @ W + b [ +QuickGELU ][ +residual ].

    Grid is (M/tm, N/tn, K/tk); K (reduction) is the last, "arbitrary" axis.
    When fuse_ln=True the wrapper forces tk == K so full rows are visible.
    Bias / activation / residual are applied only in the k==last epilogue.
    """
    i = 0
    x_ref = refs[i]; i += 1
    if fuse_ln:
        g_ref, bln_ref = refs[i], refs[i + 1]; i += 2
    w_ref, b_ref = refs[i], refs[i + 1]; i += 2
    r_ref = None
    if fuse_residual:
        r_ref = refs[i]; i += 1
    o_ref, acc_ref = refs[i], refs[i + 1]

    k = pl.program_id(2)

    @pl.when(k == 0)
    def _init():
        acc_ref[...] = jnp.zeros_like(acc_ref)

    x = x_ref[...]
    if fuse_ln:
        # LayerNorm in fp32 (matches the fp16-safe LayerNorm subclass), then cast
        # back to the compute dtype for the MXU.
        xf = x.astype(jnp.float32)
        mean = jnp.mean(xf, axis=-1, keepdims=True)
        var = jnp.mean(jnp.square(xf - mean), axis=-1, keepdims=True)
        xf = (xf - mean) * jax.lax.rsqrt(var + eps)
        xf = xf * g_ref[...].astype(jnp.float32) + bln_ref[...].astype(jnp.float32)
        x = xf.astype(x_ref.dtype)

    acc_ref[...] += jnp.dot(x, w_ref[...], preferred_element_type=jnp.float32)

    @pl.when(k == pl.num_programs(2) - 1)
    def _epilogue():
        y = acc_ref[...] + b_ref[...].astype(jnp.float32)
        if activation == "quick_gelu":
            y = y * jax.nn.sigmoid(1.702 * y)
        if fuse_residual:
            y = y + r_ref[...].astype(jnp.float32)
        o_ref[...] = y.astype(o_ref.dtype)


def _attn_kernel(qkv_ref, o_ref, *, n_head, scale):
    """One batch element per grid step.  qkv block: (1, L, 3D) -> out (1, L, D).

    Heads are split inside the kernel (no glue transposes).  Scale is folded into
    q; softmax normalization uses the EUP approximate reciprocal.
    """
    qkv = qkv_ref[0]                       # (L, 3D)
    d_model = qkv.shape[-1] // 3
    dh = d_model // n_head

    outs = []
    for h in range(n_head):                # static unroll over heads
        q = qkv[:, h * dh:(h + 1) * dh].astype(jnp.float32) * scale
        k = qkv[:, d_model + h * dh:d_model + (h + 1) * dh].astype(jnp.float32)
        v = qkv[:, 2 * d_model + h * dh:2 * d_model + (h + 1) * dh].astype(jnp.float32)
        # s = q @ k^T without materializing k.T (contract last dims).
        s = jax.lax.dot_general(q, k, (((1,), (1,)), ((), ())),
                                preferred_element_type=jnp.float32)
        s = s - jnp.max(s, axis=-1, keepdims=True)
        p = jnp.exp(s)
        p = p * pl.reciprocal(jnp.sum(p, axis=-1, keepdims=True), approx=True)
        outs.append(jnp.dot(p, v, preferred_element_type=jnp.float32))

    # Single lane-dense (L, D) store.
    o_ref[0] = jnp.concatenate(outs, axis=-1).astype(o_ref.dtype)


# ------------------------------ Pallas wrappers ----------------------------- #

def fused_linear(x2d, w_t, b, *, gamma=None, beta=None, residual=None,
                 activation=None, eps=1e-5,
                 tm_target=256, tn_target=512, tk_target=512):
    """y = [LN_{gamma,beta}](x2d) @ w_t + b [quick_gelu] [+ residual].

    w_t is pre-transposed: (D_in, D_out).
    """
    M, K = x2d.shape
    K2, N = w_t.shape
    assert K == K2
    fuse_ln = gamma is not None
    fuse_res = residual is not None

    tm = _pick_tile(M, tm_target, 8)
    tn = _pick_tile(N, tn_target, 128)
    tk = K if fuse_ln else _pick_tile(K, tk_target, 128)
    gm, gn, gk = M // tm, N // tn, K // tk

    in_specs = [pl.BlockSpec((tm, tk), lambda i, j, k: (i, k))]
    args = [x2d]
    if fuse_ln:
        in_specs += [pl.BlockSpec((1, K), lambda i, j, k: (0, 0)),
                     pl.BlockSpec((1, K), lambda i, j, k: (0, 0))]
        args += [gamma.reshape(1, K), beta.reshape(1, K)]
    in_specs += [pl.BlockSpec((tk, tn), lambda i, j, k: (k, j)),
                 pl.BlockSpec((1, tn), lambda i, j, k: (0, j))]
    args += [w_t, b.reshape(1, N)]
    if fuse_res:
        in_specs.append(pl.BlockSpec((tm, tn), lambda i, j, k: (i, j)))
        args.append(residual)

    kernel = functools.partial(_linear_kernel, activation=activation,
                               fuse_ln=fuse_ln, fuse_residual=fuse_res, eps=eps)
    return pl.pallas_call(
        kernel,
        grid=(gm, gn, gk),
        out_shape=jax.ShapeDtypeStruct((M, N), x2d.dtype),
        in_specs=in_specs,
        out_specs=pl.BlockSpec((tm, tn), lambda i, j, k: (i, j)),
        scratch_shapes=[pltpu.VMEM((tm, tn), jnp.float32)],
        compiler_params=pltpu.CompilerParams(
            dimension_semantics=("parallel", "parallel", "arbitrary"),
            vmem_limit_bytes=32 * 1024 * 1024),
    )(*args)


def attention(qkv_nld, n_head, out_dtype):
    """qkv_nld: (N, L, 3D)  ->  (N, L, D) attention output (pre out_proj)."""
    N, L, threeD = qkv_nld.shape
    D = threeD // 3
    kernel = functools.partial(_attn_kernel, n_head=n_head,
                               scale=1.0 / math.sqrt(D // n_head))
    return pl.pallas_call(
        kernel,
        grid=(N,),
        out_shape=jax.ShapeDtypeStruct((N, L, D), out_dtype),
        in_specs=[pl.BlockSpec((1, L, threeD), lambda n: (n, 0, 0))],
        out_specs=pl.BlockSpec((1, L, D), lambda n: (n, 0, 0)),
        compiler_params=pltpu.CompilerParams(
            dimension_semantics=("parallel",),
            vmem_limit_bytes=32 * 1024 * 1024),
    )(qkv_nld)


# ------------------------------ Model forward ------------------------------- #

def residual_block(x_nld, p, n_head):
    N, L, D = x_nld.shape
    M = N * L
    x2d = x_nld.reshape(M, D)

    # x = x + out_proj(attn(ln_1(x)))      (LN fused into the QKV projection,
    #                                       residual fused into out_proj epilogue)
    qkv = fused_linear(x2d, p["in_proj_w_t"], p["in_proj_b"],
                       gamma=p["ln_1_w"], beta=p["ln_1_b"])
    attn_out = attention(qkv.reshape(N, L, 3 * D), n_head, x2d.dtype).reshape(M, D)
    x2d = fused_linear(attn_out, p["out_proj_w_t"], p["out_proj_b"], residual=x2d)

    # x = x + c_proj(QuickGELU(c_fc(ln_2(x))))
    h = fused_linear(x2d, p["c_fc_w_t"], p["c_fc_b"],
                     gamma=p["ln_2_w"], beta=p["ln_2_b"],
                     activation="quick_gelu")
    x2d = fused_linear(h, p["c_proj_w_t"], p["c_proj_b"], residual=x2d)
    return x2d.reshape(N, L, D)


def transformer(x_lnd, params, n_head):
    # Module convention is (L, N, D); go batch-first once, come back once.
    x_nld = jnp.transpose(x_lnd, (1, 0, 2))
    for p in params:
        x_nld = residual_block(x_nld, p, n_head)
    return jnp.transpose(x_nld, (1, 0, 2))


# ------------------------------ Parameter init ------------------------------ #

def init_params(key, width, layers):
    params = []
    for l in range(layers):
        keys = jax.random.split(jax.random.fold_in(key, l), 4)
        in_proj_w = 0.02 * jax.random.normal(keys[0], (3 * width, width), jnp.float32)
        out_proj_w = 0.02 * jax.random.normal(keys[1], (width, width), jnp.float32)
        c_fc_w = 0.02 * jax.random.normal(keys[2], (4 * width, width), jnp.float32)
        c_proj_w = 0.02 * jax.random.normal(keys[3], (width, 4 * width), jnp.float32)
        params.append({
            # Weights stored pre-transposed to (D_in, D_out) once, outside the hot path.
            "in_proj_w_t": in_proj_w.T,
            "in_proj_b": jnp.zeros((3 * width,), jnp.float32),
            "out_proj_w_t": out_proj_w.T,
            "out_proj_b": jnp.zeros((width,), jnp.float32),
            "ln_1_w": jnp.ones((width,), jnp.float32),
            "ln_1_b": jnp.zeros((width,), jnp.float32),
            "ln_2_w": jnp.ones((width,), jnp.float32),
            "ln_2_b": jnp.zeros((width,), jnp.float32),
            "c_fc_w_t": c_fc_w.T,
            "c_fc_b": jnp.zeros((4 * width,), jnp.float32),
            "c_proj_w_t": c_proj_w.T,
            "c_proj_b": jnp.zeros((width,), jnp.float32),
        })
    return params


# ----------------------------------- Main ----------------------------------- #

if __name__ == "__main__":
    key = jax.random.PRNGKey(0)
    seq_len, batch, width, heads, layers = 8, 2, 32, 4, 2

    x = jax.random.normal(jax.random.fold_in(key, 123),
                          (seq_len, batch, width), jnp.float32)
    params = init_params(key, width, layers)

    fwd = jax.jit(functools.partial(transformer, n_head=heads))
    out = jax.block_until_ready(fwd(x, params))

    assert out.shape == (seq_len, batch, width)
    assert jnp.all(jnp.isfinite(out))
    print("KERNEL_OK")
</pallas_src>

<mosaic_0001>
module attributes {stable_mosaic.version = 11 : i64} {
  func.func @_linear_kernel(%arg0: i32, %arg1: i32, %arg2: i32, %arg3: memref<16x32xf32, #tpu.memory_space<vmem>>, %arg4: memref<32x32xf32, #tpu.memory_space<vmem>>, %arg5: memref<1x32xf32, #tpu.memory_space<vmem>>, %arg6: memref<16x32xf32, #tpu.memory_space<vmem>>, %arg7: memref<16x32xf32, #tpu.memory_space<vmem>>, %arg8: memref<16x32xf32, #tpu.memory_space<vmem>>) attributes {dimension_semantics = [#tpu.dimension_semantics<parallel>, #tpu.dimension_semantics<parallel>, #tpu.dimension_semantics<arbitrary>], iteration_bounds = array<i64: 1, 1, 1>, scalar_prefetch = 0 : i64, scratch_operands = 1 : i64, tpu.core_type = #tpu.core_type<tc>, window_params = [{transform_indices = @transform_0, window_bounds = array<i64: 16, 32>}, {transform_indices = @transform_1, window_bounds = array<i64: 32, 32>}, {transform_indices = @transform_2, window_bounds = array<i64: 1, 32>}, {transform_indices = @transform_3, window_bounds = array<i64: 16, 32>}, {transform_indices = @transform_4, window_bounds = array<i64: 16, 32>}]} {
    %c0_i32 = arith.constant 0 : i32
    %0 = arith.cmpi eq, %arg2, %c0_i32 : i32
    %1 = arith.extui %0 : i1 to i32
    %c0_i32_0 = arith.constant 0 : i32
    %2 = arith.cmpi ne, %1, %c0_i32_0 : i32
    scf.if %2 {
      %cst_10 = arith.constant 0.000000e+00 : f32
      %12 = vector.broadcast %cst_10 : f32 to vector<16x32xf32>
      %c0_11 = arith.constant 0 : index
      %c0_12 = arith.constant 0 : index
      %13 = vector.load %arg8[%c0_11, %c0_12] : memref<16x32xf32, #tpu.memory_space<vmem>>, vector<16x32xf32>
      tpu.vector_store %arg8[%c0_11, %c0_12], %12 {strides = array<i32>} : memref<16x32xf32, #tpu.memory_space<vmem>>, vector<16x32xf32>,
    } else {
    }
    %c0 = arith.constant 0 : index
    %c0_1 = arith.constant 0 : index
    %3 = vector.load %arg3[%c0, %c0_1] : memref<16x32xf32, #tpu.memory_space<vmem>>, vector<16x32xf32>
    %c0_2 = arith.constant 0 : index
    %c0_3 = arith.constant 0 : index
    %4 = vector.load %arg8[%c0_2, %c0_3] : memref<16x32xf32, #tpu.memory_space<vmem>>, vector<16x32xf32>
    %c0_4 = arith.constant 0 : index
    %c0_5 = arith.constant 0 : index
    %5 = vector.load %arg4[%c0_4, %c0_5] : memref<32x32xf32, #tpu.memory_space<vmem>>, vector<32x32xf32>
    %cst = arith.constant dense<0.000000e+00> : vector<16x32xf32>
    %6 = tpu.matmul %3, %5, %cst {dimension_numbers = #tpu.dot_dimension_numbers<[1], [0], [0], [1], [0, 0, 1, 1], [], []>} : vector<16x32xf32>, vector<32x32xf32>, vector<16x32xf32> -> vector<16x32xf32>
    %7 = arith.addf %4, %6 : vector<16x32xf32>
    %c0_6 = arith.constant 0 : index
    %c0_7 = arith.constant 0 : index
    %8 = vector.load %arg8[%c0_6, %c0_7] : memref<16x32xf32, #tpu.memory_space<vmem>>, vector<16x32xf32>
    tpu.vector_store %arg8[%c0_6, %c0_7], %7 {strides = array<i32>} : memref<16x32xf32, #tpu.memory_space<vmem>>, vector<16x32xf32>,
    %c0_i32_8 = arith.constant 0 : i32
    %9 = arith.cmpi eq, %arg2, %c0_i32_8 : i32
    %10 = arith.extui %9 : i1 to i32
    %c0_i32_9 = arith.constant 0 : i32
    %11 = arith.cmpi ne, %10, %c0_i32_9 : i32
    scf.if %11 {
      %c0_10 = arith.constant 0 : index
      %c0_11 = arith.constant 0 : index
      %12 = vector.load %arg8[%c0_10, %c0_11] : memref<16x32xf32, #tpu.memory_space<vmem>>, vector<16x32xf32>
      %c0_12 = arith.constant 0 : index
      %c0_13 = arith.constant 0 : index
      %13 = vector.load %arg5[%c0_12, %c0_13] : memref<1x32xf32, #tpu.memory_space<vmem>>, vector<1x32xf32>
      %14 = vector.broadcast %13 : vector<1x32xf32> to vector<16x32xf32>
      %15 = arith.addf %12, %14 : vector<16x32xf32>
      %c0_14 = arith.constant 0 : index
      %c0_15 = arith.constant 0 : index
      %16 = vector.load %arg6[%c0_14, %c0_15] : memref<16x32xf32, #tpu.memory_space<vmem>>, vector<16x32xf32>
      %17 = arith.addf %15, %16 : vector<16x32xf32>
      %c0_16 = arith.constant 0 : index
      %c0_17 = arith.constant 0 : index
      %18 = vector.load %arg7[%c0_16, %c0_17] : memref<16x32xf32, #tpu.memory_space<vmem>>, vector<16x32xf32>
      tpu.vector_store %arg7[%c0_16, %c0_17], %17 {strides = array<i32>} : memref<16x32xf32, #tpu.memory_space<vmem>>, vector<16x32xf32>,
    } else {
    }
    return
  }
  func.func @transform_0(%arg0: i32, %arg1: i32, %arg2: i32) -> (i32, i32) {
    %c0_i32 = arith.constant 0 : i32
    return %arg0, %arg2 : i32, i32
  }
  func.func @transform_1(%arg0: i32, %arg1: i32, %arg2: i32) -> (i32, i32) {
    %c0_i32 = arith.constant 0 : i32
    return %arg2, %arg1 : i32, i32
  }
  func.func @transform_2(%arg0: i32, %arg1: i32, %arg2: i32) -> (i32, i32) {
    %c0_i32 = arith.constant 0 : i32
    %c0_i32_0 = arith.constant 0 : i32
    return %c0_i32, %arg1 : i32, i32
  }
  func.func @transform_3(%arg0: i32, %arg1: i32, %arg2: i32) -> (i32, i32) {
    %c0_i32 = arith.constant 0 : i32
    return %arg0, %arg1 : i32, i32
  }
  func.func @transform_4(%arg0: i32, %arg1: i32, %arg2: i32) -> (i32, i32) {
    %c0_i32 = arith.constant 0 : i32
    return %arg0, %arg1 : i32, i32
  }
}

module attributes {stable_mosaic.version = 11 : i64} {
  func.func @_linear_kernel(%arg0: i32, %arg1: i32, %arg2: i32, %arg3: memref<16x32xf32, #tpu.memory_space<vmem>>, %arg4: memref<1x32xf32, #tpu.memory_space<vmem>>, %arg5: memref<1x32xf32, #tpu.memory_space<vmem>>, %arg6: memref<32x96xf32, #tpu.memory_space<vmem>>, %arg7: memref<1x96xf32, #tpu.memory_space<vmem>>, %arg8: memref<16x96xf32, #tpu.memory_space<vmem>>, %arg9: memref<16x96xf32, #tpu.memory_space<vmem>>) attributes {dimension_semantics = [#tpu.dimension_semantics<parallel>, #tpu.dimension_semantics<parallel>, #tpu.dimension_semantics<arbitrary>], iteration_bounds = array<i64: 1, 1, 1>, scalar_prefetch = 0 : i64, scratch_operands = 1 : i64, tpu.core_type = #tpu.core_type<tc>, window_params = [{transform_indices = @transform_0, window_bounds = array<i64: 16, 32>}, {pipeline_mode = #tpu.pipeline_mode<synchronous>, transform_indices = @transform_1, window_bounds = array<i64: 1, 32>}, {pipeline_mode = #tpu.pipeline_mode<synchronous>, transform_indices = @transform_2, window_bounds = array<i64: 1, 32>}, {transform_indices = @transform_3, window_bounds = array<i64: 32, 96>}, {transform_indices = @transform_4, window_bounds = array<i64: 1, 96>}, {transform_indices = @transform_5, window_bounds = array<i64: 16, 96>}]} {
    %c0_i32 = arith.constant 0 : i32
    %0 = arith.cmpi eq, %arg2, %c0_i32 : i32
    %1 = arith.extui %0 : i1 to i32
    %c0_i32_0 = arith.constant 0 : i32
    %2 = arith.cmpi ne, %1, %c0_i32_0 : i32
    scf.if %2 {
      %cst_19 = arith.constant 0.000000e+00 : f32
      %36 = vector.broadcast %cst_19 : f32 to vector<16x96xf32>
      %c0_20 = arith.constant 0 : index
      %c0_21 = arith.constant 0 : index
      %37 = vector.load %arg9[%c0_20, %c0_21] : memref<16x96xf32, #tpu.memory_space<vmem>>, vector<16x96xf32>
      tpu.vector_store %arg9[%c0_20, %c0_21], %36 {strides = array<i32>} : memref<16x96xf32, #tpu.memory_space<vmem>>, vector<16x96xf32>,
    } else {
    }
    %c0 = arith.constant 0 : index
    %c0_1 = arith.constant 0 : index
    %3 = vector.load %arg3[%c0, %c0_1] : memref<16x32xf32, #tpu.memory_space<vmem>>, vector<16x32xf32>
    %cst = arith.constant dense<0.000000e+00> : vector<16xf32>
    %4 = vector.multi_reduction <add>, %3, %cst [1] : vector<16x32xf32> to vector<16xf32>
    %5 = vector.shape_cast %4 : vector<16xf32> to vector<16x1xf32>
    %cst_2 = arith.constant 3.200000e+01 : f32
    %6 = vector.broadcast %cst_2 : f32 to vector<16x1xf32>
    %7 = arith.divf %5, %6 : vector<16x1xf32>
    %8 = vector.broadcast %7 : vector<16x1xf32> to vector<16x32xf32>
    %9 = arith.subf %3, %8 : vector<16x32xf32>
    %10 = arith.mulf %9, %9 : vector<16x32xf32>
    %cst_3 = arith.constant dense<0.000000e+00> : vector<16xf32>
    %11 = vector.multi_reduction <add>, %10, %cst_3 [1] : vector<16x32xf32> to vector<16xf32>
    %12 = vector.shape_cast %11 : vector<16xf32> to vector<16x1xf32>
    %cst_4 = arith.constant 3.200000e+01 : f32
    %13 = vector.broadcast %cst_4 : f32 to vector<16x1xf32>
    %14 = arith.divf %12, %13 : vector<16x1xf32>
    %15 = vector.broadcast %7 : vector<16x1xf32> to vector<16x32xf32>
    %16 = arith.subf %3, %15 : vector<16x32xf32>
    %cst_5 = arith.constant 9.99999974E-6 : f32
    %17 = vector.broadcast %cst_5 : f32 to vector<16x1xf32>
    %18 = arith.addf %14, %17 : vector<16x1xf32>
    %19 = math.rsqrt %18 : vector<16x1xf32>
    %20 = vector.broadcast %19 : vector<16x1xf32> to vector<16x32xf32>
    %21 = arith.mulf %16, %20 : vector<16x32xf32>
    %c0_6 = arith.constant 0 : index
    %c0_7 = arith.constant 0 : index
    %22 = vector.load %arg4[%c0_6, %c0_7] : memref<1x32xf32, #tpu.memory_space<vmem>>, vector<1x32xf32>
    %23 = vector.broadcast %22 : vector<1x32xf32> to vector<16x32xf32>
    %24 = arith.mulf %21, %23 : vector<16x32xf32>
    %c0_8 = arith.constant 0 : index
    %c0_9 = arith.constant 0 : index
    %25 = vector.load %arg5[%c0_8, %c0_9] : memref<1x32xf32, #tpu.memory_space<vmem>>, vector<1x32xf32>
    %26 = vector.broadcast %25 : vector<1x32xf32> to vector<16x32xf32>
    %27 = arith.addf %24, %26 : vector<16x32xf32>
    %c0_10 = arith.constant 0 : index
    %c0_11 = arith.constant 0 : index
    %28 = vector.load %arg9[%c0_10, %c0_11] : memref<16x96xf32, #tpu.memory_space<vmem>>, vector<16x96xf32>
    %c0_12 = arith.constant 0 : index
    %c0_13 = arith.constant 0 : index
    %29 = vector.load %arg6[%c0_12, %c0_13] : memref<32x96xf32, #tpu.memory_space<vmem>>, vector<32x96xf32>
    %cst_14 = arith.constant dense<0.000000e+00> : vector<16x96xf32>
    %30 = tpu.matmul %27, %29, %cst_14 {dimension_numbers = #tpu.dot_dimension_numbers<[1], [0], [0], [1], [0, 0, 1, 1], [], []>} : vector<16x32xf32>, vector<32x96xf32>, vector<16x96xf32> -> vector<16x96xf32>
    %31 = arith.addf %28, %30 : vector<16x96xf32>
    %c0_15 = arith.constant 0 : index
    %c0_16 = arith.constant 0 : index
    %32 = vector.load %arg9[%c0_15, %c0_16] : memref<16x96xf32, #tpu.memory_space<vmem>>, vector<16x96xf32>
    tpu.vector_store %arg9[%c0_15, %c0_16], %31 {strides = array<i32>} : memref<16x96xf32, #tpu.memory_space<vmem>>, vector<16x96xf32>,
    %c0_i32_17 = arith.constant 0 : i32
    %33 = arith.cmpi eq, %arg2, %c0_i32_17 : i32
    %34 = arith.extui %33 : i1 to i32
    %c0_i32_18 = arith.constant 0 : i32
    %35 = arith.cmpi ne, %34, %c0_i32_18 : i32
    scf.if %35 {
      %c0_19 = arith.constant 0 : index
      %c0_20 = arith.constant 0 : index
      %36 = vector.load %arg9[%c0_19, %c0_20] : memref<16x96xf32, #tpu.memory_space<vmem>>, vector<16x96xf32>
      %c0_21 = arith.constant 0 : index
      %c0_22 = arith.constant 0 : index
      %37 = vector.load %arg7[%c0_21, %c0_22] : memref<1x96xf32, #tpu.memory_space<vmem>>, vector<1x96xf32>
      %38 = vector.broadcast %37 : vector<1x96xf32> to vector<16x96xf32>
      %39 = arith.addf %36, %38 : vector<16x96xf32>
      %c0_23 = arith.constant 0 : index
      %c0_24 = arith.constant 0 : index
      %40 = vector.load %arg8[%c0_23, %c0_24] : memref<16x96xf32, #tpu.memory_space<vmem>>, vector<16x96xf32>
      tpu.vector_store %arg8[%c0_23, %c0_24], %39 {strides = array<i32>} : memref<16x96xf32, #tpu.memory_space<vmem>>, vector<16x96xf32>,
    } else {
    }
    return
  }
  func.func @transform_0(%arg0: i32, %arg1: i32, %arg2: i32) -> (i32, i32) {
    %c0_i32 = arith.constant 0 : i32
    return %arg0, %arg2 : i32, i32
  }
  func.func @transform_1(%arg0: i32, %arg1: i32, %arg2: i32) -> (i32, i32) {
    %c0_i32 = arith.constant 0 : i32
    %c0_i32_0 = arith.constant 0 : i32
    %c0_i32_1 = arith.constant 0 : i32
    return %c0_i32, %c0_i32_0 : i32, i32
  }
  func.func @transform_2(%arg0: i32, %arg1: i32, %arg2: i32) -> (i32, i32) {
    %c0_i32 = arith.constant 0 : i32
    %c0_i32_0 = arith.constant 0 : i32
    %c0_i32_1 = arith.constant 0 : i32
    return %c0_i32, %c0_i32_0 : i32, i32
  }
  func.func @transform_3(%arg0: i32, %arg1: i32, %arg2: i32) -> (i32, i32) {
    %c0_i32 = arith.constant 0 : i32
    return %arg2, %arg1 : i32, i32
  }
  func.func @transform_4(%arg0: i32, %arg1: i32, %arg2: i32) -> (i32, i32) {
    %c0_i32 = arith.constant 0 : i32
    %c0_i32_0 = arith.constant 0 : i32
    return %c0_i32, %arg1 : i32, i32
  }
  func.func @transform_5(%arg0: i32, %arg1: i32, %arg2: i32) -> (i32, i32) {
    %c0_i32 = arith.constant 0 : i32
    return %arg0, %arg1 : i32, i32
  }
}

module attributes {stable_mosaic.version = 11 : i64} {
  func.func @_attn_kernel(%arg0: i32, %arg1: memref<1x8x96xf32, #tpu.memory_space<vmem>>, %arg2: memref<1x8x32xf32, #tpu.memory_space<vmem>>) attributes {dimension_semantics = [#tpu.dimension_semantics<parallel>], iteration_bounds = array<i64: 2>, scalar_prefetch = 0 : i64, scratch_operands = 0 : i64, tpu.core_type = #tpu.core_type<tc>, window_params = [{transform_indices = @transform_0, window_bounds = array<i64: 1, 8, 96>}, {transform_indices = @transform_1, window_bounds = array<i64: 1, 8, 32>}]} {
    %c0 = arith.constant 0 : index
    %c0_0 = arith.constant 0 : index
    %c0_1 = arith.constant 0 : index
    %0 = vector.load %arg1[%c0, %c0_0, %c0_1] : memref<1x8x96xf32, #tpu.memory_space<vmem>>, vector<1x8x96xf32>
    %1 = vector.shape_cast %0 : vector<1x8x96xf32> to vector<8x96xf32>
    %2 = vector.extract_strided_slice %1 {offsets = [0, 0], sizes = [8, 8], strides = [1, 1]} : vector<8x96xf32> to vector<8x8xf32>
    %cst = arith.constant 0.353553385 : f32
    %3 = vector.broadcast %cst : f32 to vector<8x8xf32>
    %4 = arith.mulf %2, %3 : vector<8x8xf32>
    %5 = vector.extract_strided_slice %1 {offsets = [0, 32], sizes = [8, 8], strides = [1, 1]} : vector<8x96xf32> to vector<8x8xf32>
    %6 = vector.extract_strided_slice %1 {offsets = [0, 64], sizes = [8, 8], strides = [1, 1]} : vector<8x96xf32> to vector<8x8xf32>
    %cst_2 = arith.constant dense<0.000000e+00> : vector<8x8xf32>
    %7 = tpu.matmul %4, %5, %cst_2 {dimension_numbers = #tpu.dot_dimension_numbers<[1], [1], [0], [0], [0, 0, 1, 0], [], []>} : vector<8x8xf32>, vector<8x8xf32>, vector<8x8xf32> -> vector<8x8xf32>
    %cst_3 = arith.constant dense<0xFF800000> : vector<8xf32>
    %8 = vector.multi_reduction <maximumf>, %7, %cst_3 [1] : vector<8x8xf32> to vector<8xf32>
    %9 = vector.shape_cast %8 : vector<8xf32> to vector<8x1xf32>
    %10 = vector.broadcast %9 : vector<8x1xf32> to vector<8x8xf32>
    %11 = arith.subf %7, %10 : vector<8x8xf32>
    %12 = math.exp %11 : vector<8x8xf32>
    %cst_4 = arith.constant dense<0.000000e+00> : vector<8xf32>
    %13 = vector.multi_reduction <add>, %12, %cst_4 [1] : vector<8x8xf32> to vector<8xf32>
    %14 = vector.shape_cast %13 : vector<8xf32> to vector<8x1xf32>
    %15 = tpu.reciprocal %14 {approx = true} : vector<8x1xf32> -> vector<8x1xf32>
    %16 = vector.broadcast %15 : vector<8x1xf32> to vector<8x8xf32>
    %17 = arith.mulf %12, %16 : vector<8x8xf32>
    %cst_5 = arith.constant dense<0.000000e+00> : vector<8x8xf32>
    %18 = tpu.matmul %17, %6, %cst_5 {dimension_numbers = #tpu.dot_dimension_numbers<[1], [0], [0], [1], [0, 0, 1, 1], [], []>} : vector<8x8xf32>, vector<8x8xf32>, vector<8x8xf32> -> vector<8x8xf32>
    %19 = vector.extract_strided_slice %1 {offsets = [0, 8], sizes = [8, 8], strides = [1, 1]} : vector<8x96xf32> to vector<8x8xf32>
    %cst_6 = arith.constant 0.353553385 : f32
    %20 = vector.broadcast %cst_6 : f32 to vector<8x8xf32>
    %21 = arith.mulf %19, %20 : vector<8x8xf32>
    %22 = vector.extract_strided_slice %1 {offsets = [0, 40], sizes = [8, 8], strides = [1, 1]} : vector<8x96xf32> to vector<8x8xf32>
    %23 = vector.extract_strided_slice %1 {offsets = [0, 72], sizes = [8, 8], strides = [1, 1]} : vector<8x96xf32> to vector<8x8xf32>
    %cst_7 = arith.constant dense<0.000000e+00> : vector<8x8xf32>
    %24 = tpu.matmul %21, %22, %cst_7 {dimension_numbers = #tpu.dot_dimension_numbers<[1], [1], [0], [0], [0, 0, 1, 0], [], []>} : vector<8x8xf32>, vector<8x8xf32>, vector<8x8xf32> -> vector<8x8xf32>
    %cst_8 = arith.constant dense<0xFF800000> : vector<8xf32>
    %25 = vector.multi_reduction <maximumf>, %24, %cst_8 [1] : vector<8x8xf32> to vector<8xf32>
    %26 = vector.shape_cast %25 : vector<8xf32> to vector<8x1xf32>
    %27 = vector.broadcast %26 : vector<8x1xf32> to vector<8x8xf32>
    %28 = arith.subf %24, %27 : vector<8x8xf32>
    %29 = math.exp %28 : vector<8x8xf32>
    %cst_9 = arith.constant dense<0.000000e+00> : vector<8xf32>
    %30 = vector.multi_reduction <add>, %29, %cst_9 [1] : vector<8x8xf32> to vector<8xf32>
    %31 = vector.shape_cast %30 : vector<8xf32> to vector<8x1xf32>
    %32 = tpu.reciprocal %31 {approx = true} : vector<8x1xf32> -> vector<8x1xf32>
    %33 = vector.broadcast %32 : vector<8x1xf32> to vector<8x8xf32>
    %34 = arith.mulf %29, %33 : vector<8x8xf32>
    %cst_10 = arith.constant dense<0.000000e+00> : vector<8x8xf32>
    %35 = tpu.matmul %34, %23, %cst_10 {dimension_numbers = #tpu.dot_dimension_numbers<[1], [0], [0], [1], [0, 0, 1, 1], [], []>} : vector<8x8xf32>, vector<8x8xf32>, vector<8x8xf32> -> vector<8x8xf32>
    %36 = vector.extract_strided_slice %1 {offsets = [0, 16], sizes = [8, 8], strides = [1, 1]} : vector<8x96xf32> to vector<8x8xf32>
    %cst_11 = arith.constant 0.353553385 : f32
    %37 = vector.broadcast %cst_11 : f32 to vector<8x8xf32>
    %38 = arith.mulf %36, %37 : vector<8x8xf32>
    %39 = vector.extract_strided_slice %1 {offsets = [0, 48], sizes = [8, 8], strides = [1, 1]} : vector<8x96xf32> to vector<8x8xf32>
    %40 = vector.extract_strided_slice %1 {offsets = [0, 80], sizes = [8, 8], strides = [1, 1]} : vector<8x96xf32> to vector<8x8xf32>
    %cst_12 = arith.constant dense<0.000000e+00> : vector<8x8xf32>
    %41 = tpu.matmul %38, %39, %cst_12 {dimension_numbers = #tpu.dot_dimension_numbers<[1], [1], [0], [0], [0, 0, 1, 0], [], []>} : vector<8x8xf32>, vector<8x8xf32>, vector<8x8xf32> -> vector<8x8xf32>
    %cst_13 = arith.constant dense<0xFF800000> : vector<8xf32>
    %42 = vector.multi_reduction <maximumf>, %41, %cst_13 [1] : vector<8x8xf32> to vector<8xf32>
    %43 = vector.shape_cast %42 : vector<8xf32> to vector<8x1xf32>
    %44 = vector.broadcast %43 : vector<8x1xf32> to vector<8x8xf32>
    %45 = arith.subf %41, %44 : vector<8x8xf32>
    %46 = math.exp %45 : vector<8x8xf32>
    %cst_14 = arith.constant dense<0.000000e+00> : vector<8xf32>
    %47 = vector.multi_reduction <add>, %46, %cst_14 [1] : vector<8x8xf32> to vector<8xf32>
    %48 = vector.shape_cast %47 : vector<8xf32> to vector<8x1xf32>
    %49 = tpu.reciprocal %48 {approx = true} : vector<8x1xf32> -> vector<8x1xf32>
    %50 = vector.broadcast %49 : vector<8x1xf32> to vector<8x8xf32>
    %51 = arith.mulf %46, %50 : vector<8x8xf32>
    %cst_15 = arith.constant dense<0.000000e+00> : vector<8x8xf32>
    %52 = tpu.matmul %51, %40, %cst_15 {dimension_numbers = #tpu.dot_dimension_numbers<[1], [0], [0], [1], [0, 0, 1, 1], [], []>} : vector<8x8xf32>, vector<8x8xf32>, vector<8x8xf32> -> vector<8x8xf32>
    %53 = vector.extract_strided_slice %1 {offsets = [0, 24], sizes = [8, 8], strides = [1, 1]} : vector<8x96xf32> to vector<8x8xf32>
    %cst_16 = arith.constant 0.353553385 : f32
    %54 = vector.broadcast %cst_16 : f32 to vector<8x8xf32>
    %55 = arith.mulf %53, %54 : vector<8x8xf32>
    %56 = vector.extract_strided_slice %1 {offsets = [0, 56], sizes = [8, 8], strides = [1, 1]} : vector<8x96xf32> to vector<8x8xf32>
    %57 = vector.extract_strided_slice %1 {offsets = [0, 88], sizes = [8, 8], strides = [1, 1]} : vector<8x96xf32> to vector<8x8xf32>
    %cst_17 = arith.constant dense<0.000000e+00> : vector<8x8xf32>
    %58 = tpu.matmul %55, %56, %cst_17 {dimension_numbers = #tpu.dot_dimension_numbers<[1], [1], [0], [0], [0, 0, 1, 0], [], []>} : vector<8x8xf32>, vector<8x8xf32>, vector<8x8xf32> -> vector<8x8xf32>
    %cst_18 = arith.constant dense<0xFF800000> : vector<8xf32>
    %59 = vector.multi_reduction <maximumf>, %58, %cst_18 [1] : vector<8x8xf32> to vector<8xf32>
    %60 = vector.shape_cast %59 : vector<8xf32> to vector<8x1xf32>
    %61 = vector.broadcast %60 : vector<8x1xf32> to vector<8x8xf32>
    %62 = arith.subf %58, %61 : vector<8x8xf32>
    %63 = math.exp %62 : vector<8x8xf32>
    %cst_19 = arith.constant dense<0.000000e+00> : vector<8xf32>
    %64 = vector.multi_reduction <add>, %63, %cst_19 [1] : vector<8x8xf32> to vector<8xf32>
    %65 = vector.shape_cast %64 : vector<8xf32> to vector<8x1xf32>
    %66 = tpu.reciprocal %65 {approx = true} : vector<8x1xf32> -> vector<8x1xf32>
    %67 = vector.broadcast %66 : vector<8x1xf32> to vector<8x8xf32>
    %68 = arith.mulf %63, %67 : vector<8x8xf32>
    %cst_20 = arith.constant dense<0.000000e+00> : vector<8x8xf32>
    %69 = tpu.matmul %68, %57, %cst_20 {dimension_numbers = #tpu.dot_dimension_numbers<[1], [0], [0], [1], [0, 0, 1, 1], [], []>} : vector<8x8xf32>, vector<8x8xf32>, vector<8x8xf32> -> vector<8x8xf32>
    %70 = tpu.concatenate %18, %35, %52, %69 in 1 : vector<8x8xf32>, vector<8x8xf32>, vector<8x8xf32>, vector<8x8xf32> -> vector<8x32xf32>
    %c0_21 = arith.constant 0 : index
    %c0_22 = arith.constant 0 : index
    %c0_23 = arith.constant 0 : index
    %71 = vector.load %arg2[%c0_21, %c0_22, %c0_23] : memref<1x8x32xf32, #tpu.memory_space<vmem>>, vector<1x8x32xf32>
    %72 = vector.shape_cast %71 : vector<1x8x32xf32> to vector<8x32xf32>
    %73 = vector.shape_cast %70 : vector<8x32xf32> to vector<1x8x32xf32>
    tpu.vector_store %arg2[%c0_21, %c0_22, %c0_23], %73 {strides = array<i32>} : memref<1x8x32xf32, #tpu.memory_space<vmem>>, vector<1x8x32xf32>,
    return
  }
  func.func @transform_0(%arg0: i32) -> (i32, i32, i32) {
    %c0_i32 = arith.constant 0 : i32
    %c0_i32_0 = arith.constant 0 : i32
    %c0_i32_1 = arith.constant 0 : i32
    return %arg0, %c0_i32, %c0_i32_0 : i32, i32, i32
  }
  func.func @transform_1(%arg0: i32) -> (i32, i32, i32) {
    %c0_i32 = arith.constant 0 : i32
    %c0_i32_0 = arith.constant 0 : i32
    %c0_i32_1 = arith.constant 0 : i32
    return %arg0, %c0_i32, %c0_i32_0 : i32, i32, i32
  }
}

module attributes {stable_mosaic.version = 11 : i64} {
  func.func @_linear_kernel(%arg0: i32, %arg1: i32, %arg2: i32, %arg3: memref<16x32xf32, #tpu.memory_space<vmem>>, %arg4: memref<1x32xf32, #tpu.memory_space<vmem>>, %arg5: memref<1x32xf32, #tpu.memory_space<vmem>>, %arg6: memref<32x128xf32, #tpu.memory_space<vmem>>, %arg7: memref<1x128xf32, #tpu.memory_space<vmem>>, %arg8: memref<16x128xf32, #tpu.memory_space<vmem>>, %arg9: memref<16x128xf32, #tpu.memory_space<vmem>>) attributes {dimension_semantics = [#tpu.dimension_semantics<parallel>, #tpu.dimension_semantics<parallel>, #tpu.dimension_semantics<arbitrary>], iteration_bounds = array<i64: 1, 1, 1>, scalar_prefetch = 0 : i64, scratch_operands = 1 : i64, tpu.core_type = #tpu.core_type<tc>, window_params = [{transform_indices = @transform_0, window_bounds = array<i64: 16, 32>}, {pipeline_mode = #tpu.pipeline_mode<synchronous>, transform_indices = @transform_1, window_bounds = array<i64: 1, 32>}, {pipeline_mode = #tpu.pipeline_mode<synchronous>, transform_indices = @transform_2, window_bounds = array<i64: 1, 32>}, {transform_indices = @transform_3, window_bounds = array<i64: 32, 128>}, {transform_indices = @transform_4, window_bounds = array<i64: 1, 128>}, {transform_indices = @transform_5, window_bounds = array<i64: 16, 128>}]} {
    %c0_i32 = arith.constant 0 : i32
    %0 = arith.cmpi eq, %arg2, %c0_i32 : i32
    %1 = arith.extui %0 : i1 to i32
    %c0_i32_0 = arith.constant 0 : i32
    %2 = arith.cmpi ne, %1, %c0_i32_0 : i32
    scf.if %2 {
      %cst_19 = arith.constant 0.000000e+00 : f32
      %36 = vector.broadcast %cst_19 : f32 to vector<16x128xf32>
      %c0_20 = arith.constant 0 : index
      %c0_21 = arith.constant 0 : index
      %37 = vector.load %arg9[%c0_20, %c0_21] : memref<16x128xf32, #tpu.memory_space<vmem>>, vector<16x128xf32>
      tpu.vector_store %arg9[%c0_20, %c0_21], %36 {strides = array<i32>} : memref<16x128xf32, #tpu.memory_space<vmem>>, vector<16x128xf32>,
    } else {
    }
    %c0 = arith.constant 0 : index
    %c0_1 = arith.constant 0 : index
    %3 = vector.load %arg3[%c0, %c0_1] : memref<16x32xf32, #tpu.memory_space<vmem>>, vector<16x32xf32>
    %cst = arith.constant dense<0.000000e+00> : vector<16xf32>
    %4 = vector.multi_reduction <add>, %3, %cst [1] : vector<16x32xf32> to vector<16xf32>
    %5 = vector.shape_cast %4 : vector<16xf32> to vector<16x1xf32>
    %cst_2 = arith.constant 3.200000e+01 : f32
    %6 = vector.broadcast %cst_2 : f32 to vector<16x1xf32>
    %7 = arith.divf %5, %6 : vector<16x1xf32>
    %8 = vector.broadcast %7 : vector<16x1xf32> to vector<16x32xf32>
    %9 = arith.subf %3, %8 : vector<16x32xf32>
    %10 = arith.mulf %9, %9 : vector<16x32xf32>
    %cst_3 = arith.constant dense<0.000000e+00> : vector<16xf32>
    %11 = vector.multi_reduction <add>, %10, %cst_3 [1] : vector<16x32xf32> to vector<16xf32>
    %12 = vector.shape_cast %11 : vector<16xf32> to vector<16x1xf32>
    %cst_4 = arith.constant 3.200000e+01 : f32
    %13 = vector.broadcast %cst_4 : f32 to vector<16x1xf32>
    %14 = arith.divf %12, %13 : vector<16x1xf32>
    %15 = vector.broadcast %7 : vector<16x1xf32> to vector<16x32xf32>
    %16 = arith.subf %3, %15 : vector<16x32xf32>
    %cst_5 = arith.constant 9.99999974E-6 : f32
    %17 = vector.broadcast %cst_5 : f32 to vector<16x1xf32>
    %18 = arith.addf %14, %17 : vector<16x1xf32>
    %19 = math.rsqrt %18 : vector<16x1xf32>
    %20 = vector.broadcast %19 : vector<16x1xf32> to vector<16x32xf32>
    %21 = arith.mulf %16, %20 : vector<16x32xf32>
    %c0_6 = arith.constant 0 : index
    %c0_7 = arith.constant 0 : index
    %22 = vector.load %arg4[%c0_6, %c0_7] : memref<1x32xf32, #tpu.memory_space<vmem>>, vector<1x32xf32>
    %23 = vector.broadcast %22 : vector<1x32xf32> to vector<16x32xf32>
    %24 = arith.mulf %21, %23 : vector<16x32xf32>
    %c0_8 = arith.constant 0 : index
    %c0_9 = arith.constant 0 : index
    %25 = vector.load %arg5[%c0_8, %c0_9] : memref<1x32xf32, #tpu.memory_space<vmem>>, vector<1x32xf32>
    %26 = vector.broadcast %25 : vector<1x32xf32> to vector<16x32xf32>
    %27 = arith.addf %24, %26 : vector<16x32xf32>
    %c0_10 = arith.constant 0 : index
    %c0_11 = arith.constant 0 : index
    %28 = vector.load %arg9[%c0_10, %c0_11] : memref<16x128xf32, #tpu.memory_space<vmem>>, vector<16x128xf32>
    %c0_12 = arith.constant 0 : index
    %c0_13 = arith.constant 0 : index
    %29 = vector.load %arg6[%c0_12, %c0_13] : memref<32x128xf32, #tpu.memory_space<vmem>>, vector<32x128xf32>
    %cst_14 = arith.constant dense<0.000000e+00> : vector<16x128xf32>
    %30 = tpu.matmul %27, %29, %cst_14 {dimension_numbers = #tpu.dot_dimension_numbers<[1], [0], [0], [1], [0, 0, 1, 1], [], []>} : vector<16x32xf32>, vector<32x128xf32>, vector<16x128xf32> -> vector<16x128xf32>
    %31 = arith.addf %28, %30 : vector<16x128xf32>
    %c0_15 = arith.constant 0 : index
    %c0_16 = arith.constant 0 : index
    %32 = vector.load %arg9[%c0_15, %c0_16] : memref<16x128xf32, #tpu.memory_space<vmem>>, vector<16x128xf32>
    tpu.vector_store %arg9[%c0_15, %c0_16], %31 {strides = array<i32>} : memref<16x128xf32, #tpu.memory_space<vmem>>, vector<16x128xf32>,
    %c0_i32_17 = arith.constant 0 : i32
    %33 = arith.cmpi eq, %arg2, %c0_i32_17 : i32
    %34 = arith.extui %33 : i1 to i32
    %c0_i32_18 = arith.constant 0 : i32
    %35 = arith.cmpi ne, %34, %c0_i32_18 : i32
    scf.if %35 {
      %c0_19 = arith.constant 0 : index
      %c0_20 = arith.constant 0 : index
      %36 = vector.load %arg9[%c0_19, %c0_20] : memref<16x128xf32, #tpu.memory_space<vmem>>, vector<16x128xf32>
      %c0_21 = arith.constant 0 : index
      %c0_22 = arith.constant 0 : index
      %37 = vector.load %arg7[%c0_21, %c0_22] : memref<1x128xf32, #tpu.memory_space<vmem>>, vector<1x128xf32>
      %38 = vector.broadcast %37 : vector<1x128xf32> to vector<16x128xf32>
      %39 = arith.addf %36, %38 : vector<16x128xf32>
      %cst_23 = arith.constant 1.702000e+00 : f32
      %40 = vector.broadcast %cst_23 : f32 to vector<16x128xf32>
      %41 = arith.mulf %40, %39 : vector<16x128xf32>
      %42 = arith.negf %41 : vector<16x128xf32>
      %43 = math.exp %42 : vector<16x128xf32>
      %cst_24 = arith.constant 1.000000e+00 : f32
      %44 = vector.broadcast %cst_24 : f32 to vector<16x128xf32>
      %45 = arith.addf %44, %43 : vector<16x128xf32>
      %46 = arith.divf %44, %45 : vector<16x128xf32>
      %47 = arith.mulf %39, %46 : vector<16x128xf32>
      %c0_25 = arith.constant 0 : index
      %c0_26 = arith.constant 0 : index
      %48 = vector.load %arg8[%c0_25, %c0_26] : memref<16x128xf32, #tpu.memory_space<vmem>>, vector<16x128xf32>
      tpu.vector_store %arg8[%c0_25, %c0_26], %47 {strides = array<i32>} : memref<16x128xf32, #tpu.memory_space<vmem>>, vector<16x128xf32>,
    } else {
    }
    return
  }
  func.func @transform_0(%arg0: i32, %arg1: i32, %arg2: i32) -> (i32, i32) {
    %c0_i32 = arith.constant 0 : i32
    return %arg0, %arg2 : i32, i32
  }
  func.func @transform_1(%arg0: i32, %arg1: i32, %arg2: i32) -> (i32, i32) {
    %c0_i32 = arith.constant 0 : i32
    %c0_i32_0 = arith.constant 0 : i32
    %c0_i32_1 = arith.constant 0 : i32
    return %c0_i32, %c0_i32_0 : i32, i32
  }
  func.func @transform_2(%arg0: i32, %arg1: i32, %arg2: i32) -> (i32, i32) {
    %c0_i32 = arith.constant 0 : i32
    %c0_i32_0 = arith.constant 0 : i32
    %c0_i32_1 = arith.constant 0 : i32
    return %c0_i32, %c0_i32_0 : i32, i32
  }
  func.func @transform_3(%arg0: i32, %arg1: i32, %arg2: i32) -> (i32, i32) {
    %c0_i32 = arith.constant 0 : i32
    return %arg2, %arg1 : i32, i32
  }
  func.func @transform_4(%arg0: i32, %arg1: i32, %arg2: i32) -> (i32, i32) {
    %c0_i32 = arith.constant 0 : i32
    %c0_i32_0 = arith.constant 0 : i32
    return %c0_i32, %arg1 : i32, i32
  }
  func.func @transform_5(%arg0: i32, %arg1: i32, %arg2: i32) -> (i32, i32) {
    %c0_i32 = arith.constant 0 : i32
    return %arg0, %arg1 : i32, i32
  }
}

module attributes {stable_mosaic.version = 11 : i64} {
  func.func @_linear_kernel(%arg0: i32, %arg1: i32, %arg2: i32, %arg3: memref<16x128xf32, #tpu.memory_space<vmem>>, %arg4: memref<128x32xf32, #tpu.memory_space<vmem>>, %arg5: memref<1x32xf32, #tpu.memory_space<vmem>>, %arg6: memref<16x32xf32, #tpu.memory_space<vmem>>, %arg7: memref<16x32xf32, #tpu.memory_space<vmem>>, %arg8: memref<16x32xf32, #tpu.memory_space<vmem>>) attributes {dimension_semantics = [#tpu.dimension_semantics<parallel>, #tpu.dimension_semantics<parallel>, #tpu.dimension_semantics<arbitrary>], iteration_bounds = array<i64: 1, 1, 1>, scalar_prefetch = 0 : i64, scratch_operands = 1 : i64, tpu.core_type = #tpu.core_type<tc>, window_params = [{transform_indices = @transform_0, window_bounds = array<i64: 16, 128>}, {transform_indices = @transform_1, window_bounds = array<i64: 128, 32>}, {transform_indices = @transform_2, window_bounds = array<i64: 1, 32>}, {transform_indices = @transform_3, window_bounds = array<i64: 16, 32>}, {transform_indices = @transform_4, window_bounds = array<i64: 16, 32>}]} {
    %c0_i32 = arith.constant 0 : i32
    %0 = arith.cmpi eq, %arg2, %c0_i32 : i32
    %1 = arith.extui %0 : i1 to i32
    %c0_i32_0 = arith.constant 0 : i32
    %2 = arith.cmpi ne, %1, %c0_i32_0 : i32
    scf.if %2 {
      %cst_10 = arith.constant 0.000000e+00 : f32
      %12 = vector.broadcast %cst_10 : f32 to vector<16x32xf32>
      %c0_11 = arith.constant 0 : index
      %c0_12 = arith.constant 0 : index
      %13 = vector.load %arg8[%c0_11, %c0_12] : memref<16x32xf32, #tpu.memory_space<vmem>>, vector<16x32xf32>
      tpu.vector_store %arg8[%c0_11, %c0_12], %12 {strides = array<i32>} : memref<16x32xf32, #tpu.memory_space<vmem>>, vector<16x32xf32>,
    } else {
    }
    %c0 = arith.constant 0 : index
    %c0_1 = arith.constant 0 : index
    %3 = vector.load %arg3[%c0, %c0_1] : memref<16x128xf32, #tpu.memory_space<vmem>>, vector<16x128xf32>
    %c0_2 = arith.constant 0 : index
    %c0_3 = arith.constant 0 : index
    %4 = vector.load %arg8[%c0_2, %c0_3] : memref<16x32xf32, #tpu.memory_space<vmem>>, vector<16x32xf32>
    %c0_4 = arith.constant 0 : index
    %c0_5 = arith.constant 0 : index
    %5 = vector.load %arg4[%c0_4, %c0_5] : memref<128x32xf32, #tpu.memory_space<vmem>>, vector<128x32xf32>
    %cst = arith.constant dense<0.000000e+00> : vector<16x32xf32>
    %6 = tpu.matmul %3, %5, %cst {dimension_numbers = #tpu.dot_dimension_numbers<[1], [0], [0], [1], [0, 0, 1, 1], [], []>} : vector<16x128xf32>, vector<128x32xf32>, vector<16x32xf32> -> vector<16x32xf32>
    %7 = arith.addf %4, %6 : vector<16x32xf32>
    %c0_6 = arith.constant 0 : index
    %c0_7 = arith.constant 0 : index
    %8 = vector.load %arg8[%c0_6, %c0_7] : memref<16x32xf32, #tpu.memory_space<vmem>>, vector<16x32xf32>
    tpu.vector_store %arg8[%c0_6, %c0_7], %7 {strides = array<i32>} : memref<16x32xf32, #tpu.memory_space<vmem>>, vector<16x32xf32>,
    %c0_i32_8 = arith.constant 0 : i32
    %9 = arith.cmpi eq, %arg2, %c0_i32_8 : i32
    %10 = arith.extui %9 : i1 to i32
    %c0_i32_9 = arith.constant 0 : i32
    %11 = arith.cmpi ne, %10, %c0_i32_9 : i32
    scf.if %11 {
      %c0_10 = arith.constant 0 : index
      %c0_11 = arith.constant 0 : index
      %12 = vector.load %arg8[%c0_10, %c0_11] : memref<16x32xf32, #tpu.memory_space<vmem>>, vector<16x32xf32>
      %c0_12 = arith.constant 0 : index
      %c0_13 = arith.constant 0 : index
      %13 = vector.load %arg5[%c0_12, %c0_13] : memref<1x32xf32, #tpu.memory_space<vmem>>, vector<1x32xf32>
      %14 = vector.broadcast %13 : vector<1x32xf32> to vector<16x32xf32>
      %15 = arith.addf %12, %14 : vector<16x32xf32>
      %c0_14 = arith.constant 0 : index
      %c0_15 = arith.constant 0 : index
      %16 = vector.load %arg6[%c0_14, %c0_15] : memref<16x32xf32, #tpu.memory_space<vmem>>, vector<16x32xf32>
      %17 = arith.addf %15, %16 : vector<16x32xf32>
      %c0_16 = arith.constant 0 : index
      %c0_17 = arith.constant 0 : index
      %18 = vector.load %arg7[%c0_16, %c0_17] : memref<16x32xf32, #tpu.memory_space<vmem>>, vector<16x32xf32>
      tpu.vector_store %arg7[%c0_16, %c0_17], %17 {strides = array<i32>} : memref<16x32xf32, #tpu.memory_space<vmem>>, vector<16x32xf32>,
    } else {
    }
    return
  }
  func.func @transform_0(%arg0: i32, %arg1: i32, %arg2: i32) -> (i32, i32) {
    %c0_i32 = arith.constant 0 : i32
    return %arg0, %arg2 : i32, i32
  }
  func.func @transform_1(%arg0: i32, %arg1: i32, %arg2: i32) -> (i32, i32) {
    %c0_i32 = arith.constant 0 : i32
    return %arg2, %arg1 : i32, i32
  }
  func.func @transform_2(%arg0: i32, %arg1: i32, %arg2: i32) -> (i32, i32) {
    %c0_i32 = arith.constant 0 : i32
    %c0_i32_0 = arith.constant 0 : i32
    return %c0_i32, %arg1 : i32, i32
  }
  func.func @transform_3(%arg0: i32, %arg1: i32, %arg2: i32) -> (i32, i32) {
    %c0_i32 = arith.constant 0 : i32
    return %arg0, %arg1 : i32, i32
  }
  func.func @transform_4(%arg0: i32, %arg1: i32, %arg2: i32) -> (i32, i32) {
    %c0_i32 = arith.constant 0 : i32
    return %arg0, %arg1 : i32, i32
  }
}

module attributes {stable_mosaic.version = 11 : i64} {
  func.func @_linear_kernel(%arg0: i32, %arg1: i32, %arg2: i32, %arg3: memref<16x32xf32, #tpu.memory_space<vmem>>, %arg4: memref<1x32xf32, #tpu.memory_space<vmem>>, %arg5: memref<1x32xf32, #tpu.memory_space<vmem>>, %arg6: memref<32x96xf32, #tpu.memory_space<vmem>>, %arg7: memref<1x96xf32, #tpu.memory_space<vmem>>, %arg8: memref<16x96xf32, #tpu.memory_space<vmem>>, %arg9: memref<16x96xf32, #tpu.memory_space<vmem>>) attributes {dimension_semantics = [#tpu.dimension_semantics<parallel>, #tpu.dimension_semantics<parallel>, #tpu.dimension_semantics<arbitrary>], iteration_bounds = array<i64: 1, 1, 1>, scalar_prefetch = 0 : i64, scratch_operands = 1 : i64, tpu.core_type = #tpu.core_type<tc>, window_params = [{transform_indices = @transform_0, window_bounds = array<i64: 16, 32>}, {pipeline_mode = #tpu.pipeline_mode<synchronous>, transform_indices = @transform_1, window_bounds = array<i64: 1, 32>}, {pipeline_mode = #tpu.pipeline_mode<synchronous>, transform_indices = @transform_2, window_bounds = array<i64: 1, 32>}, {transform_indices = @transform_3, window_bounds = array<i64: 32, 96>}, {transform_indices = @transform_4, window_bounds = array<i64: 1, 96>}, {transform_indices = @transform_5, window_bounds = array<i64: 16, 96>}]} {
    %c0_i32 = arith.constant 0 : i32
    %0 = arith.cmpi eq, %arg2, %c0_i32 : i32
    %1 = arith.extui %0 : i1 to i32
    %c0_i32_0 = arith.constant 0 : i32
    %2 = arith.cmpi ne, %1, %c0_i32_0 : i32
    scf.if %2 {
      %cst_19 = arith.constant 0.000000e+00 : f32
      %36 = vector.broadcast %cst_19 : f32 to vector<16x96xf32>
      %c0_20 = arith.constant 0 : index
      %c0_21 = arith.constant 0 : index
      %37 = vector.load %arg9[%c0_20, %c0_21] : memref<16x96xf32, #tpu.memory_space<vmem>>, vector<16x96xf32>
      tpu.vector_store %arg9[%c0_20, %c0_21], %36 {strides = array<i32>} : memref<16x96xf32, #tpu.memory_space<vmem>>, vector<16x96xf32>,
    } else {
    }
    %c0 = arith.constant 0 : index
    %c0_1 = arith.constant 0 : index
    %3 = vector.load %arg3[%c0, %c0_1] : memref<16x32xf32, #tpu.memory_space<vmem>>, vector<16x32xf32>
    %cst = arith.constant dense<0.000000e+00> : vector<16xf32>
    %4 = vector.multi_reduction <add>, %3, %cst [1] : vector<16x32xf32> to vector<16xf32>
    %5 = vector.shape_cast %4 : vector<16xf32> to vector<16x1xf32>
    %cst_2 = arith.constant 3.200000e+01 : f32
    %6 = vector.broadcast %cst_2 : f32 to vector<16x1xf32>
    %7 = arith.divf %5, %6 : vector<16x1xf32>
    %8 = vector.broadcast %7 : vector<16x1xf32> to vector<16x32xf32>
    %9 = arith.subf %3, %8 : vector<16x32xf32>
    %10 = arith.mulf %9, %9 : vector<16x32xf32>
    %cst_3 = arith.constant dense<0.000000e+00> : vector<16xf32>
    %11 = vector.multi_reduction <add>, %10, %cst_3 [1] : vector<16x32xf32> to vector<16xf32>
    %12 = vector.shape_cast %11 : vector<16xf32> to vector<16x1xf32>
    %cst_4 = arith.constant 3.200000e+01 : f32
    %13 = vector.broadcast %cst_4 : f32 to vector<16x1xf32>
    %14 = arith.divf %12, %13 : vector<16x1xf32>
    %15 = vector.broadcast %7 : vector<16x1xf32> to vector<16x32xf32>
    %16 = arith.subf %3, %15 : vector<16x32xf32>
    %cst_5 = arith.constant 9.99999974E-6 : f32
    %17 = vector.broadcast %cst_5 : f32 to vector<16x1xf32>
    %18 = arith.addf %14, %17 : vector<16x1xf32>
    %19 = math.rsqrt %18 : vector<16x1xf32>
    %20 = vector.broadcast %19 : vector<16x1xf32> to vector<16x32xf32>
    %21 = arith.mulf %16, %20 : vector<16x32xf32>
    %c0_6 = arith.constant 0 : index
    %c0_7 = arith.constant 0 : index
    %22 = vector.load %arg4[%c0_6, %c0_7] : memref<1x32xf32, #tpu.memory_space<vmem>>, vector<1x32xf32>
    %23 = vector.broadcast %22 : vector<1x32xf32> to vector<16x32xf32>
    %24 = arith.mulf %21, %23 : vector<16x32xf32>
    %c0_8 = arith.constant 0 : index
    %c0_9 = arith.constant 0 : index
    %25 = vector.load %arg5[%c0_8, %c0_9] : memref<1x32xf32, #tpu.memory_space<vmem>>, vector<1x32xf32>
    %26 = vector.broadcast %25 : vector<1x32xf32> to vector<16x32xf32>
    %27 = arith.addf %24, %26 : vector<16x32xf32>
    %c0_10 = arith.constant 0 : index
    %c0_11 = arith.constant 0 : index
    %28 = vector.load %arg9[%c0_10, %c0_11] : memref<16x96xf32, #tpu.memory_space<vmem>>, vector<16x96xf32>
    %c0_12 = arith.constant 0 : index
    %c0_13 = arith.constant 0 : index
    %29 = vector.load %arg6[%c0_12, %c0_13] : memref<32x96xf32, #tpu.memory_space<vmem>>, vector<32x96xf32>
    %cst_14 = arith.constant dense<0.000000e+00> : vector<16x96xf32>
    %30 = tpu.matmul %27, %29, %cst_14 {dimension_numbers = #tpu.dot_dimension_numbers<[1], [0], [0], [1], [0, 0, 1, 1], [], []>} : vector<16x32xf32>, vector<32x96xf32>, vector<16x96xf32> -> vector<16x96xf32>
    %31 = arith.addf %28, %30 : vector<16x96xf32>
    %c0_15 = arith.constant 0 : index
    %c0_16 = arith.constant 0 : index
    %32 = vector.load %arg9[%c0_15, %c0_16] : memref<16x96xf32, #tpu.memory_space<vmem>>, vector<16x96xf32>
    tpu.vector_store %arg9[%c0_15, %c0_16], %31 {strides = array<i32>} : memref<16x96xf32, #tpu.memory_space<vmem>>, vector<16x96xf32>,
    %c0_i32_17 = arith.constant 0 : i32
    %33 = arith.cmpi eq, %arg2, %c0_i32_17 : i32
    %34 = arith.extui %33 : i1 to i32
    %c0_i32_18 = arith.constant 0 : i32
    %35 = arith.cmpi ne, %34, %c0_i32_18 : i32
    scf.if %35 {
      %c0_19 = arith.constant 0 : index
      %c0_20 = arith.constant 0 : index
      %36 = vector.load %arg9[%c0_19, %c0_20] : memref<16x96xf32, #tpu.memory_space<vmem>>, vector<16x96xf32>
      %c0_21 = arith.constant 0 : index
      %c0_22 = arith.constant 0 : index
      %37 = vector.load %arg7[%c0_21, %c0_22] : memref<1x96xf32, #tpu.memory_space<vmem>>, vector<1x96xf32>
      %38 = vector.broadcast %37 : vector<1x96xf32> to vector<16x96xf32>
      %39 = arith.addf %36, %38 : vector<16x96xf32>
      %c0_23 = arith.constant 0 : index
      %c0_24 = arith.constant 0 : index
      %40 = vector.load %arg8[%c0_23, %c0_24] : memref<16x96xf32, #tpu.memory_space<vmem>>, vector<16x96xf32>
      tpu.vector_store %arg8[%c0_23, %c0_24], %39 {strides = array<i32>} : memref<16x96xf32, #tpu.memory_space<vmem>>, vector<16x96xf32>,
    } else {
    }
    return
  }
  func.func @transform_0(%arg0: i32, %arg1: i32, %arg2: i32) -> (i32, i32) {
    %c0_i32 = arith.constant 0 : i32
    return %arg0, %arg2 : i32, i32
  }
  func.func @transform_1(%arg0: i32, %arg1: i32, %arg2: i32) -> (i32, i32) {
    %c0_i32 = arith.constant 0 : i32
    %c0_i32_0 = arith.constant 0 : i32
    %c0_i32_1 = arith.constant 0 : i32
    return %c0_i32, %c0_i32_0 : i32, i32
  }
  func.func @transform_2(%arg0: i32, %arg1: i32, %arg2: i32) -> (i32, i32) {
    %c0_i32 = arith.constant 0 : i32
    %c0_i32_0 = arith.constant 0 : i32
    %c0_i32_1 = arith.constant 0 : i32
    return %c0_i32, %c0_i32_0 : i32, i32
  }
  func.func @transform_3(%arg0: i32, %arg1: i32, %arg2: i32) -> (i32, i32) {
    %c0_i32 = arith.constant 0 : i32
    return %arg2, %arg1 : i32, i32
  }
  func.func @transform_4(%arg0: i32, %arg1: i32, %arg2: i32) -> (i32, i32) {
    %c0_i32 = arith.constant 0 : i32
    %c0_i32_0 = arith.constant 0 : i32
    return %c0_i32, %arg1 : i32, i32
  }
  func.func @transform_5(%arg0: i32, %arg1: i32, %arg2: i32) -> (i32, i32) {
    %c0_i32 = arith.constant 0 : i32
    return %arg0, %arg1 : i32, i32
  }
}

module attributes {stable_mosaic.version = 11 : i64} {
  func.func @_linear_kernel(%arg0: i32, %arg1: i32, %arg2: i32, %arg3: memref<16x32xf32, #tpu.memory_space<vmem>>, %arg4: memref<32x32xf32, #tpu.memory_space<vmem>>, %arg5: memref<1x32xf32, #tpu.memory_space<vmem>>, %arg6: memref<16x32xf32, #tpu.memory_space<vmem>>, %arg7: memref<16x32xf32, #tpu.memory_space<vmem>>, %arg8: memref<16x32xf32, #tpu.memory_space<vmem>>) attributes {dimension_semantics = [#tpu.dimension_semantics<parallel>, #tpu.dimension_semantics<parallel>, #tpu.dimension_semantics<arbitrary>], iteration_bounds = array<i64: 1, 1, 1>, scalar_prefetch = 0 : i64, scratch_operands = 1 : i64, tpu.core_type = #tpu.core_type<tc>, window_params = [{transform_indices = @transform_0, window_bounds = array<i64: 16, 32>}, {transform_indices = @transform_1, window_bounds = array<i64: 32, 32>}, {transform_indices = @transform_2, window_bounds = array<i64: 1, 32>}, {transform_indices = @transform_3, window_bounds = array<i64: 16, 32>}, {transform_indices = @transform_4, window_bounds = array<i64: 16, 32>}]} {
    %c0_i32 = arith.constant 0 : i32
    %0 = arith.cmpi eq, %arg2, %c0_i32 : i32
    %1 = arith.extui %0 : i1 to i32
    %c0_i32_0 = arith.constant 0 : i32
    %2 = arith.cmpi ne, %1, %c0_i32_0 : i32
    scf.if %2 {
      %cst_10 = arith.constant 0.000000e+00 : f32
      %12 = vector.broadcast %cst_10 : f32 to vector<16x32xf32>
      %c0_11 = arith.constant 0 : index
      %c0_12 = arith.constant 0 : index
      %13 = vector.load %arg8[%c0_11, %c0_12] : memref<16x32xf32, #tpu.memory_space<vmem>>, vector<16x32xf32>
      tpu.vector_store %arg8[%c0_11, %c0_12], %12 {strides = array<i32>} : memref<16x32xf32, #tpu.memory_space<vmem>>, vector<16x32xf32>,
    } else {
    }
    %c0 = arith.constant 0 : index
    %c0_1 = arith.constant 0 : index
    %3 = vector.load %arg3[%c0, %c0_1] : memref<16x32xf32, #tpu.memory_space<vmem>>, vector<16x32xf32>
    %c0_2 = arith.constant 0 : index
    %c0_3 = arith.constant 0 : index
    %4 = vector.load %arg8[%c0_2, %c0_3] : memref<16x32xf32, #tpu.memory_space<vmem>>, vector<16x32xf32>
    %c0_4 = arith.constant 0 : index
    %c0_5 = arith.constant 0 : index
    %5 = vector.load %arg4[%c0_4, %c0_5] : memref<32x32xf32, #tpu.memory_space<vmem>>, vector<32x32xf32>
    %cst = arith.constant dense<0.000000e+00> : vector<16x32xf32>
    %6 = tpu.matmul %3, %5, %cst {dimension_numbers = #tpu.dot_dimension_numbers<[1], [0], [0], [1], [0, 0, 1, 1], [], []>} : vector<16x32xf32>, vector<32x32xf32>, vector<16x32xf32> -> vector<16x32xf32>
    %7 = arith.addf %4, %6 : vector<16x32xf32>
    %c0_6 = arith.constant 0 : index
    %c0_7 = arith.constant 0 : index
    %8 = vector.load %arg8[%c0_6, %c0_7] : memref<16x32xf32, #tpu.memory_space<vmem>>, vector<16x32xf32>
    tpu.vector_store %arg8[%c0_6, %c0_7], %7 {strides = array<i32>} : memref<16x32xf32, #tpu.memory_space<vmem>>, vector<16x32xf32>,
    %c0_i32_8 = arith.constant 0 : i32
    %9 = arith.cmpi eq, %arg2, %c0_i32_8 : i32
    %10 = arith.extui %9 : i1 to i32
    %c0_i32_9 = arith.constant 0 : i32
    %11 = arith.cmpi ne, %10, %c0_i32_9 : i32
    scf.if %11 {
      %c0_10 = arith.constant 0 : index
      %c0_11 = arith.constant 0 : index
      %12 = vector.load %arg8[%c0_10, %c0_11] : memref<16x32xf32, #tpu.memory_space<vmem>>, vector<16x32xf32>
      %c0_12 = arith.constant 0 : index
      %c0_13 = arith.constant 0 : index
      %13 = vector.load %arg5[%c0_12, %c0_13] : memref<1x32xf32, #tpu.memory_space<vmem>>, vector<1x32xf32>
      %14 = vector.broadcast %13 : vector<1x32xf32> to vector<16x32xf32>
      %15 = arith.addf %12, %14 : vector<16x32xf32>
      %c0_14 = arith.constant 0 : index
      %c0_15 = arith.constant 0 : index
      %16 = vector.load %arg6[%c0_14, %c0_15] : memref<16x32xf32, #tpu.memory_space<vmem>>, vector<16x32xf32>
      %17 = arith.addf %15, %16 : vector<16x32xf32>
      %c0_16 = arith.constant 0 : index
      %c0_17 = arith.constant 0 : index
      %18 = vector.load %arg7[%c0_16, %c0_17] : memref<16x32xf32, #tpu.memory_space<vmem>>, vector<16x32xf32>
      tpu.vector_store %arg7[%c0_16, %c0_17], %17 {strides = array<i32>} : memref<16x32xf32, #tpu.memory_space<vmem>>, vector<16x32xf32>,
    } else {
    }
    return
  }
  func.func @transform_0(%arg0: i32, %arg1: i32, %arg2: i32) -> (i32, i32) {
    %c0_i32 = arith.constant 0 : i32
    return %arg0, %arg2 : i32, i32
  }
  func.func @transform_1(%arg0: i32, %arg1: i32, %arg2: i32) -> (i32, i32) {
    %c0_i32 = arith.constant 0 : i32
    return %arg2, %arg1 : i32, i32
  }
  func.func @transform_2(%arg0: i32, %arg1: i32, %arg2: i32) -> (i32, i32) {
    %c0_i32 = arith.constant 0 : i32
    %c0_i32_0 = arith.constant 0 : i32
    return %c0_i32, %arg1 : i32, i32
  }
  func.func @transform_3(%arg0: i32, %arg1: i32, %arg2: i32) -> (i32, i32) {
    %c0_i32 = arith.constant 0 : i32
    return %arg0, %arg1 : i32, i32
  }
  func.func @transform_4(%arg0: i32, %arg1: i32, %arg2: i32) -> (i32, i32) {
    %c0_i32 = arith.constant 0 : i32
    return %arg0, %arg1 : i32, i32
  }
}

module attributes {stable_mosaic.version = 11 : i64} {
  func.func @_linear_kernel(%arg0: i32, %arg1: i32, %arg2: i32, %arg3: memref<16x32xf32, #tpu.memory_space<vmem>>, %arg4: memref<1x32xf32, #tpu.memory_space<vmem>>, %arg5: memref<1x32xf32, #tpu.memory_space<vmem>>, %arg6: memref<32x128xf32, #tpu.memory_space<vmem>>, %arg7: memref<1x128xf32, #tpu.memory_space<vmem>>, %arg8: memref<16x128xf32, #tpu.memory_space<vmem>>, %arg9: memref<16x128xf32, #tpu.memory_space<vmem>>) attributes {dimension_semantics = [#tpu.dimension_semantics<parallel>, #tpu.dimension_semantics<parallel>, #tpu.dimension_semantics<arbitrary>], iteration_bounds = array<i64: 1, 1, 1>, scalar_prefetch = 0 : i64, scratch_operands = 1 : i64, tpu.core_type = #tpu.core_type<tc>, window_params = [{transform_indices = @transform_0, window_bounds = array<i64: 16, 32>}, {pipeline_mode = #tpu.pipeline_mode<synchronous>, transform_indices = @transform_1, window_bounds = array<i64: 1, 32>}, {pipeline_mode = #tpu.pipeline_mode<synchronous>, transform_indices = @transform_2, window_bounds = array<i64: 1, 32>}, {transform_indices = @transform_3, window_bounds = array<i64: 32, 128>}, {transform_indices = @transform_4, window_bounds = array<i64: 1, 128>}, {transform_indices = @transform_5, window_bounds = array<i64: 16, 128>}]} {
    %c0_i32 = arith.constant 0 : i32
    %0 = arith.cmpi eq, %arg2, %c0_i32 : i32
    %1 = arith.extui %0 : i1 to i32
    %c0_i32_0 = arith.constant 0 : i32
    %2 = arith.cmpi ne, %1, %c0_i32_0 : i32
    scf.if %2 {
      %cst_19 = arith.constant 0.000000e+00 : f32
      %36 = vector.broadcast %cst_19 : f32 to vector<16x128xf32>
      %c0_20 = arith.constant 0 : index
      %c0_21 = arith.constant 0 : index
      %37 = vector.load %arg9[%c0_20, %c0_21] : memref<16x128xf32, #tpu.memory_space<vmem>>, vector<16x128xf32>
      tpu.vector_store %arg9[%c0_20, %c0_21], %36 {strides = array<i32>} : memref<16x128xf32, #tpu.memory_space<vmem>>, vector<16x128xf32>,
    } else {
    }
    %c0 = arith.constant 0 : index
    %c0_1 = arith.constant 0 : index
    %3 = vector.load %arg3[%c0, %c0_1] : memref<16x32xf32, #tpu.memory_space<vmem>>, vector<16x32xf32>
    %cst = arith.constant dense<0.000000e+00> : vector<16xf32>
    %4 = vector.multi_reduction <add>, %3, %cst [1] : vector<16x32xf32> to vector<16xf32>
    %5 = vector.shape_cast %4 : vector<16xf32> to vector<16x1xf32>
    %cst_2 = arith.constant 3.200000e+01 : f32
    %6 = vector.broadcast %cst_2 : f32 to vector<16x1xf32>
    %7 = arith.divf %5, %6 : vector<16x1xf32>
    %8 = vector.broadcast %7 : vector<16x1xf32> to vector<16x32xf32>
    %9 = arith.subf %3, %8 : vector<16x32xf32>
    %10 = arith.mulf %9, %9 : vector<16x32xf32>
    %cst_3 = arith.constant dense<0.000000e+00> : vector<16xf32>
    %11 = vector.multi_reduction <add>, %10, %cst_3 [1] : vector<16x32xf32> to vector<16xf32>
    %12 = vector.shape_cast %11 : vector<16xf32> to vector<16x1xf32>
    %cst_4 = arith.constant 3.200000e+01 : f32
    %13 = vector.broadcast %cst_4 : f32 to vector<16x1xf32>
    %14 = arith.divf %12, %13 : vector<16x1xf32>
    %15 = vector.broadcast %7 : vector<16x1xf32> to vector<16x32xf32>
    %16 = arith.subf %3, %15 : vector<16x32xf32>
    %cst_5 = arith.constant 9.99999974E-6 : f32
    %17 = vector.broadcast %cst_5 : f32 to vector<16x1xf32>
    %18 = arith.addf %14, %17 : vector<16x1xf32>
    %19 = math.rsqrt %18 : vector<16x1xf32>
    %20 = vector.broadcast %19 : vector<16x1xf32> to vector<16x32xf32>
    %21 = arith.mulf %16, %20 : vector<16x32xf32>
    %c0_6 = arith.constant 0 : index
    %c0_7 = arith.constant 0 : index
    %22 = vector.load %arg4[%c0_6, %c0_7] : memref<1x32xf32, #tpu.memory_space<vmem>>, vector<1x32xf32>
    %23 = vector.broadcast %22 : vector<1x32xf32> to vector<16x32xf32>
    %24 = arith.mulf %21, %23 : vector<16x32xf32>
    %c0_8 = arith.constant 0 : index
    %c0_9 = arith.constant 0 : index
    %25 = vector.load %arg5[%c0_8, %c0_9] : memref<1x32xf32, #tpu.memory_space<vmem>>, vector<1x32xf32>
    %26 = vector.broadcast %25 : vector<1x32xf32> to vector<16x32xf32>
    %27 = arith.addf %24, %26 : vector<16x32xf32>
    %c0_10 = arith.constant 0 : index
    %c0_11 = arith.constant 0 : index
    %28 = vector.load %arg9[%c0_10, %c0_11] : memref<16x128xf32, #tpu.memory_space<vmem>>, vector<16x128xf32>
    %c0_12 = arith.constant 0 : index
    %c0_13 = arith.constant 0 : index
    %29 = vector.load %arg6[%c0_12, %c0_13] : memref<32x128xf32, #tpu.memory_space<vmem>>, vector<32x128xf32>
    %cst_14 = arith.constant dense<0.000000e+00> : vector<16x128xf32>
    %30 = tpu.matmul %27, %29, %cst_14 {dimension_numbers = #tpu.dot_dimension_numbers<[1], [0], [0], [1], [0, 0, 1, 1], [], []>} : vector<16x32xf32>, vector<32x128xf32>, vector<16x128xf32> -> vector<16x128xf32>
    %31 = arith.addf %28, %30 : vector<16x128xf32>
    %c0_15 = arith.constant 0 : index
    %c0_16 = arith.constant 0 : index
    %32 = vector.load %arg9[%c0_15, %c0_16] : memref<16x128xf32, #tpu.memory_space<vmem>>, vector<16x128xf32>
    tpu.vector_store %arg9[%c0_15, %c0_16], %31 {strides = array<i32>} : memref<16x128xf32, #tpu.memory_space<vmem>>, vector<16x128xf32>,
    %c0_i32_17 = arith.constant 0 : i32
    %33 = arith.cmpi eq, %arg2, %c0_i32_17 : i32
    %34 = arith.extui %33 : i1 to i32
    %c0_i32_18 = arith.constant 0 : i32
    %35 = arith.cmpi ne, %34, %c0_i32_18 : i32
    scf.if %35 {
      %c0_19 = arith.constant 0 : index
      %c0_20 = arith.constant 0 : index
      %36 = vector.load %arg9[%c0_19, %c0_20] : memref<16x128xf32, #tpu.memory_space<vmem>>, vector<16x128xf32>
      %c0_21 = arith.constant 0 : index
      %c0_22 = arith.constant 0 : index
      %37 = vector.load %arg7[%c0_21, %c0_22] : memref<1x128xf32, #tpu.memory_space<vmem>>, vector<1x128xf32>
      %38 = vector.broadcast %37 : vector<1x128xf32> to vector<16x128xf32>
      %39 = arith.addf %36, %38 : vector<16x128xf32>
      %cst_23 = arith.constant 1.702000e+00 : f32
      %40 = vector.broadcast %cst_23 : f32 to vector<16x128xf32>
      %41 = arith.mulf %40, %39 : vector<16x128xf32>
      %42 = arith.negf %41 : vector<16x128xf32>
      %43 = math.exp %42 : vector<16x128xf32>
      %cst_24 = arith.constant 1.000000e+00 : f32
      %44 = vector.broadcast %cst_24 : f32 to vector<16x128xf32>
      %45 = arith.addf %44, %43 : vector<16x128xf32>
      %46 = arith.divf %44, %45 : vector<16x128xf32>
      %47 = arith.mulf %39, %46 : vector<16x128xf32>
      %c0_25 = arith.constant 0 : index
      %c0_26 = arith.constant 0 : index
      %48 = vector.load %arg8[%c0_25, %c0_26] : memref<16x128xf32, #tpu.memory_space<vmem>>, vector<16x128xf32>
      tpu.vector_store %arg8[%c0_25, %c0_26], %47 {strides = array<i32>} : memref<16x128xf32, #tpu.memory_space<vmem>>, vector<16x128xf32>,
    } else {
    }
    return
  }
  func.func @transform_0(%arg0: i32, %arg1: i32, %arg2: i32) -> (i32, i32) {
    %c0_i32 = arith.constant 0 : i32
    return %arg0, %arg2 : i32, i32
  }
  func.func @transform_1(%arg0: i32, %arg1: i32, %arg2: i32) -> (i32, i32) {
    %c0_i32 = arith.constant 0 : i32
    %c0_i32_0 = arith.constant 0 : i32
    %c0_i32_1 = arith.constant 0 : i32
    return %c0_i32, %c0_i32_0 : i32, i32
  }
  func.func @transform_2(%arg0: i32, %arg1: i32, %arg2: i32) -> (i32, i32) {
    %c0_i32 = arith.constant 0 : i32
    %c0_i32_0 = arith.constant 0 : i32
    %c0_i32_1 = arith.constant 0 : i32
    return %c0_i32, %c0_i32_0 : i32, i32
  }
  func.func @transform_3(%arg0: i32, %arg1: i32, %arg2: i32) -> (i32, i32) {
    %c0_i32 = arith.constant 0 : i32
    return %arg2, %arg1 : i32, i32
  }
  func.func @transform_4(%arg0: i32, %arg1: i32, %arg2: i32) -> (i32, i32) {
    %c0_i32 = arith.constant 0 : i32
    %c0_i32_0 = arith.constant 0 : i32
    return %c0_i32, %arg1 : i32, i32
  }
  func.func @transform_5(%arg0: i32, %arg1: i32, %arg2: i32) -> (i32, i32) {
    %c0_i32 = arith.constant 0 : i32
    return %arg0, %arg1 : i32, i32
  }
}

</mosaic_0001>

<bundles_post_ra>
// kernel: transformer.12
= control target key start
LH: loop header
LB: loop body
LE: loop exit
PB: predicated region body
PF: predicated region fallthrough
CT: control target
= control target key end

     0   :  { %9 = vsyncpa [#allocation4], 0  ;;  %s137_s18 = smov [#allocation3]   ;;  %s205_s0 = inlined_call_operand.vmem [shape: f32[16,32], index: 0, kind: input, shape index: {}]   ;;  %s206_s1 = inlined_call_operand.vmem [shape: f32[32,32], index: 1, kind: input, shape index: {}]   ;;  %s207_s2 = inlined_call_operand.hbm [shape: f32[1,32], index: 2, kind: input, shape index: {}]   ;;  %s208_s3 = inlined_call_operand.vmem [shape: f32[16,32], index: 3, kind: input, shape index: {}]   ;;  %s209_s4 = inlined_call_operand.vmem [shape: f32[16,32], index: 4, kind: output, shape index: {}]  }
   0x1   :  { %s19_s17 = sshll.u32 %s207_s2, 4  ;;  %s21_s19 = sshll.u32 %s137_s18, 4  ;;  %s20_s17 = int_to_ptr.hbm [resolvable:$true] %s19_s17  ;;  %s22_s19 = int_to_ptr.vmem [resolvable:$true] %s21_s19 }
   0x2   :  { %24 = dma.hbm_to_vmem [thread:$0]  %s20_s17, 16, %s22_s19, [#allocation4]  }
   0x3   :  { %135 = dma.done.wait [#allocation4], 16  }
   0x4   :  { %136 = vsyncadd [#allocation4], 4294967280  ;;  %vm35_vm0 = vcmask 261120   ;;  %v138_v0 = vmov 0.0   ;;  %v45_v1 = vld [vmem:[%s206_s1 + $0x18] sm:$0xff]  ;;  %v44_v2 = vld [vmem:[%s206_s1 + $0x10] sm:$0xff] }
   0x5   :  { %36 = vst.msk [vmem:[#allocation2] sm:$0xff] %vm35_vm0, %v138_v0  ;;  %65 = vmatpush.msra.mxu0 %v45_v1  ;;  %104 = vmatpush.msra.mxu1 %v45_v1  ;;  %v43_v3 = vld [vmem:[%s206_s1 + $0x8] sm:$0xff]  ;;  %v42_v4 = vld [vmem:[%s206_s1] sm:$0xff]  ;;  %v110_v13 = vld [vmem:[#allocation3] ss:$0 sm:$0xff] }
   0x6   :  { %37 = vst.msk [vmem:[#allocation2 + $0x8] sm:$0xff] %vm35_vm0, %v138_v0  ;;  %v38_v5 = vld [vmem:[%s205_s0] sm:$0xff]  ;;  %v39_v6 = vld [vmem:[%s205_s0 + $0x8] sm:$0xff] }
   0x7   :  { %66 = vmatpush.msra.mxu0 %v44_v2  ;;  %105 = vmatpush.msra.mxu1 %v44_v2  ;;  %v91_v15 = vld [vmem:[%s208_s3] sm:$0xff]  ;;  %v92_v18 = vld [vmem:[%s208_s3 + $0x8] sm:$0xff] }
   0x9   :  { %67 = vmatpush.msra.mxu0 %v43_v3  ;;  %106 = vmatpush.msra.mxu1 %v43_v3 }
   0xb   :  { %68 = vmatpush.msra.mxu0 %v42_v4  ;;  %107 = vmatpush.msra.mxu1 %v42_v4 }
   0xc   :  { %102 = vmatmul.msk.f32.vlgmr.msra.gmra.mxu0 %vm35_vm0, %v38_v5  ;;  %103 = vmatmul.msk.f32.vlgmr.msra.gmra.mxu1 %vm35_vm0, %v39_v6  ;;  %v40_v7 = vld [vmem:[#allocation2] sm:$0xff] }
   0xd   :  { %v41_v8 = vld [vmem:[#allocation2 + $0x8] sm:$0xff] }
  0x89   :  { %v70_v9 = vpop.f32.mrf.mxu0  ;;  %v73_v10 = vpop.f32.mrf.mxu1 }
  0x8a   :  { %v76_v11 = vadd.f32 %v70_v9, %v40_v7  ;;  %v77_v12 = vadd.f32 %v73_v10, %v41_v8 }
  0x8c   :  { %78 = vst.msk [vmem:[#allocation2] sm:$0xff] %vm35_vm0, %v76_v11 }
  0x8d   :  { %79 = vst.msk [vmem:[#allocation2 + $0x8] sm:$0xff] %vm35_vm0, %v77_v12 }
  0x93   :  { %v83_v14 = vld [vmem:[#allocation2] sm:$0xff] }
  0x94   :  { %v89_v16 = vadd.f32 %v110_v13, %v83_v14  ;;  %v84_v17 = vld [vmem:[#allocation2 + $0x8] sm:$0xff] }
  0x95   :  { %v90_v19 = vadd.f32 %v110_v13, %v84_v17 }
  0x96   :  { %v93_v20 = vadd.f32 %v91_v15, %v89_v16 }
  0x97   :  { %v94_v21 = vadd.f32 %v92_v18, %v90_v19 }
  0x98   :  { %95 = vst.msk [vmem:[%s209_s4] sm:$0xff] %vm35_vm0, %v93_v20 }
  0x99   :  { %96 = vst.msk [vmem:[%s209_s4 + $0x8] sm:$0xff] %vm35_vm0, %v94_v21 }
  0x9a   :  { %101 = vsyncpa [#allocation4], 1 }

// kernel: transformer.10
= control target key start
LH: loop header
LB: loop body
LE: loop exit
PB: predicated region body
PF: predicated region fallthrough
CT: control target
= control target key end

     0   :  { %10 = vsyncpa [#allocation4], 0  ;;  %s366_s0 = inlined_call_operand.vmem [shape: f32[16,32], index: 0, kind: input, shape index: {}]   ;;  %s367_s1 = inlined_call_operand.vmem [shape: f32[1,32], index: 1, kind: input, shape index: {}]   ;;  %s368_s2 = inlined_call_operand.hbm [shape: f32[1,32], index: 2, kind: input, shape index: {}]   ;;  %s369_s3 = inlined_call_operand.hbm [shape: f32[32,96], index: 3, kind: input, shape index: {}]   ;;  %s370_s4 = inlined_call_operand.hbm [shape: f32[1,96], index: 4, kind: input, shape index: {}]   ;;  %s371_s5 = inlined_call_operand.vmem [shape: f32[16,96], index: 5, kind: output, shape index: {}]  }
   0x1   :  { %11 = vsyncpa [#allocation6], 0  ;;  %s31_s20 = sshll.u32 %s369_s3, 4  ;;  %s293_s21 = smov [#allocation5]   ;;  %s32_s20 = int_to_ptr.hbm [resolvable:$true] %s31_s20 }
   0x2   :  { %s33_s22 = sshll.u32 %s293_s21, 4  ;;  %s21_s25 = sshll.u32 %s368_s2, 4  ;;  %s34_s22 = int_to_ptr.vmem [resolvable:$true] %s33_s22  ;;  %s22_s25 = int_to_ptr.hbm [resolvable:$true] %s21_s25 }
   0x3   :  { %s294_s26 = smov 128   ;;  %s295_s27 = smov 8  }
   0x4   :  { %39 = dma.hbm_to_vmem [thread:$0]  %s32_s20, 512, %s34_s22, [#allocation6], %s294_s26, %s294_s26, %s295_s27  }
   0x5   :  { %s296_s28 = smov [#allocation3]   ;;  %s45_s7 = sshll.u32 %s370_s4, 4  ;;  %s46_s7 = int_to_ptr.hbm [resolvable:$true] %s45_s7 }
   0x6   :  { %s23_s29 = sshll.u32 %s296_s28, 4  ;;  %s297_s3 = smov [#allocation7]   ;;  %s24_s29 = int_to_ptr.vmem [resolvable:$true] %s23_s29 }
   0x7   :  { %26 = dma.hbm_to_vmem [thread:$0]  %s22_s25, 16, %s24_s29, [#allocation4]  }
   0x8   :  { %s47_s8 = sshll.u32 %s297_s3, 4  ;;  %s48_s8 = int_to_ptr.vmem [resolvable:$true] %s47_s8 }
   0x9   :  { %50 = dma.hbm_to_vmem [thread:$0]  %s46_s7, 16, %s48_s8, [#allocation6]  }
   0xa   :  { %289 = dma.done.wait [#allocation4], 16  }
   0xb   :  { %290 = vsyncadd [#allocation4], 4294967280 }
   0xc   :  { %291 = dma.done.wait [#allocation6], 528  }
   0xd   :  { %292 = vsyncadd [#allocation6], 4294966768  ;;  %vm72_vm0 = vcmask 261120   ;;  %v70_v0 = vld [vmem:[%s366_s0] sm:$0xff]  ;;  %v71_v2 = vld [vmem:[%s366_s0 + $0x8] sm:$0xff]  ;;  %v298_v4 = vmov 32.0  }
   0xe   :  { %v73_v1 = vsel %vm72_vm0, %v70_v0, 0.0  ;;  %v76_v3 = vsel %vm72_vm0, %v71_v2, 0.0  ;;  %211 = vrcp.f32 %v298_v4  ;;  %v141_v21 = vld [vmem:[#allocation5 + $0x18] sm:$0xff]  ;;  %v140_v22 = vld [vmem:[#allocation5 + $0x10] sm:$0xff]  ;;  %v139_v23 = vld [vmem:[#allocation5 + $0x8] sm:$0xff]  ;;  %vm67_vm2 = vcmask 785408  }
   0xf   :  { %74 = vadd.xlane.f32.xlu0 %v73_v1  ;;  %160 = vmatpush.msra.mxu0 %v141_v21  ;;  %v138_v24 = vld [vmem:[#allocation5] sm:$0xff]  ;;  %v299_v28 = vmov 0.0   ;;  %v208_v40 = vld [vmem:[%s367_s1] ss:$0 sm:$0xff]  ;;  %v209_v44 = vld [vmem:[#allocation3] ss:$0 sm:$0xff] }
  0x10   :  { %197 = vmatpush.msra.mxu1 %v141_v21  ;;  %68 = vst.msk [vmem:[#allocation2] sm:$0xff] %vm67_vm2, %v299_v28  ;;  %v210_v58 = vld [vmem:[#allocation7] ss:$0 sm:$0xff] }
  0x11   :  { %161 = vmatpush.msra.mxu0 %v140_v22  ;;  %69 = vst.msk [vmem:[#allocation2 + $0x8] sm:$0xff] %vm67_vm2, %v299_v28 }
  0x12   :  { %198 = vmatpush.msra.mxu1 %v140_v22 }
  0x13   :  { %162 = vmatpush.msra.mxu0 %v139_v23 }
  0x14   :  { %v212_v5 = vpop.eup %211  ;;  %199 = vmatpush.msra.mxu1 %v139_v23 }
  0x15   :  { %v80_v6 = vmul.f32 32.0, %v212_v5  ;;  %vm84_vm1 = vweird.f32 %v212_v5  ;;  %163 = vmatpush.msra.mxu0 %v138_v24 }
  0x16   :  { %200 = vmatpush.msra.mxu1 %v138_v24 }
  0x17   :  { %77 = vadd.xlane.f32.xlu0 %v76_v3  ;;  %v81_v7 = vsub.f32 1.0, %v80_v6  ;;  %v136_v54 = vld [vmem:[#allocation2] sm:$0xff] }
  0x18   :  { %v137_v57 = vld [vmem:[#allocation2 + $0x8] sm:$0xff] }
  0x19   :  { %v82_v8 = vmul.f32 %v212_v5, %v81_v7 }
  0x1b   :  { %v83_v9 = vadd.f32 %v212_v5, %v82_v8 }
  0x1d   :  { %v85_v10 = vsel %vm84_vm1, %v212_v5, %v83_v9 }
  0x82   :  { %v75_v11 = vpop.xlane.xlu0 %74 }
  0x83   :  { %v86_v12 = vmul.f32 %v85_v10, %v75_v11 }
  0x85   :  { %v88_v13 = vsub.f32 %v70_v0, %v86_v12 }
  0x87   :  { %v90_v14 = vmul.f32 %v88_v13, %v88_v13 }
  0x89   :  { %v92_v15 = vsel %vm72_vm0, %v90_v14, 0.0 }
  0x8a   :  { %93 = vadd.xlane.f32.xlu1 %v92_v15  ;;  %v78_v16 = vpop.xlane.xlu0 %77 }
  0x8b   :  { %v87_v17 = vmul.f32 %v85_v10, %v78_v16 }
  0x8d   :  { %v89_v18 = vsub.f32 %v71_v2, %v87_v17 }
  0x8f   :  { %v91_v19 = vmul.f32 %v89_v18, %v89_v18 }
  0x91   :  { %v95_v20 = vsel %vm72_vm0, %v91_v19, 0.0 }
  0x92   :  { %96 = vadd.xlane.f32.xlu1 %v95_v20 }
  0xfd   :  { %v94_v25 = vpop.xlane.xlu1 %93 }
  0xfe   :  { %v98_v26 = vmul.f32 %v94_v25, %v85_v10 }
 0x100   :  { %v100_v27 = vadd.f32 1e-05, %v98_v26 }
 0x102   :  { %213 = vrsqrt.f32 %v100_v27  ;;  %vm108_vm4 = vweird.f32 %v100_v27 }
 0x105   :  { %v97_v29 = vpop.xlane.xlu1 %96 }
 0x106   :  { %v99_v30 = vmul.f32 %v97_v29, %v85_v10 }
 0x108   :  { %v214_v31 = vpop.eup %213  ;;  %v101_v32 = vadd.f32 1e-05, %v99_v30 }
 0x109   :  { %v103_v33 = vmul.f32 %v214_v31, %v100_v27  ;;  %vm109_vm3 = vweird.f32 %v214_v31 }
 0x10a   :  { %215 = vrsqrt.f32 %v101_v32  ;;  %vm110_vm5 = vmor %vm108_vm4, %vm109_vm3  ;;  %vm118_vm7 = vweird.f32 %v101_v32 }
 0x10b   :  { %v104_v34 = vmul.f32 %v214_v31, %v103_v33 }
 0x10d   :  { %v105_v35 = vmul.f32 0.5, %v104_v34 }
 0x10f   :  { %v106_v36 = vsub.f32 1.5, %v105_v35 }
 0x110   :  { %v216_v37 = vpop.eup %215 }
 0x111   :  { %v107_v38 = vmul.f32 %v214_v31, %v106_v36  ;;  %v113_v39 = vmul.f32 %v216_v37, %v101_v32  ;;  %vm119_vm6 = vweird.f32 %v216_v37 }
 0x112   :  { %vm120_vm8 = vmor %vm118_vm7, %vm119_vm6 }
 0x113   :  { %v111_v41 = vsel %vm110_vm5, %v214_v31, %v107_v38  ;;  %v114_v42 = vmul.f32 %v216_v37, %v113_v39 }
 0x114   :  { %v122_v43 = vmul.f32 %v111_v41, %v88_v13 }
 0x115   :  { %v115_v45 = vmul.f32 0.5, %v114_v42 }
 0x116   :  { %v128_v46 = vmul.f32 %v208_v40, %v122_v43 }
 0x117   :  { %v116_v47 = vsub.f32 1.5, %v115_v45 }
 0x118   :  { %v134_v48 = vadd.f32 %v209_v44, %v128_v46 }
 0x119   :  { %v117_v49 = vmul.f32 %v216_v37, %v116_v47 }
 0x11a   :  { %195 = vmatmul.msk.f32.vlgmr.msra.gmra.mxu0 %vm72_vm0, %v134_v48 }
 0x11b   :  { %v121_v50 = vsel %vm120_vm8, %v216_v37, %v117_v49 }
 0x11c   :  { %v123_v51 = vmul.f32 %v121_v50, %v89_v18 }
 0x11e   :  { %v129_v52 = vmul.f32 %v208_v40, %v123_v51 }
 0x120   :  { %v135_v53 = vadd.f32 %v209_v44, %v129_v52 }
 0x122   :  { %196 = vmatmul.msk.f32.vlgmr.msra.gmra.mxu1 %vm72_vm0, %v135_v53 }
 0x197   :  { %v165_v55 = vpop.f32.mrf.mxu0 }
 0x198   :  { %v171_v56 = vadd.f32 %v165_v55, %v136_v54 }
 0x19a   :  { %174 = vst.msk [vmem:[#allocation2] sm:$0xff] %vm67_vm2, %v171_v56 }
 0x19f   :  { %v168_v59 = vpop.f32.mrf.mxu1 }
 0x1a0   :  { %v172_v60 = vadd.f32 %v168_v59, %v137_v57 }
 0x1a1   :  { %v179_v61 = vld [vmem:[#allocation2] sm:$0xff] }
 0x1a2   :  { %v185_v62 = vadd.f32 %v210_v58, %v179_v61  ;;  %175 = vst.msk [vmem:[#allocation2 + $0x8] sm:$0xff] %vm67_vm2, %v172_v60 }
 0x1a4   :  { %187 = vst.msk [vmem:[%s371_s5] sm:$0xff] %vm67_vm2, %v185_v62 }
 0x1a9   :  { %v180_v63 = vld [vmem:[#allocation2 + $0x8] sm:$0xff] }
 0x1aa   :  { %v186_v0 = vadd.f32 %v210_v58, %v180_v63 }
 0x1ac   :  { %188 = vst.msk [vmem:[%s371_s5 + $0x8] sm:$0xff] %vm67_vm2, %v186_v0 }
 0x1ad   :  { %193 = vsyncpa [#allocation4], 1 }
 0x1ae   :  { %194 = vsyncpa [#allocation6], 1 }

// kernel: transformer.11
= control target key start
LH: loop header
LB: loop body
LE: loop exit
PB: predicated region body
PF: predicated region fallthrough
CT: control target
= control target key end

     0   :  { %s538_s6 = smov 0   ;;  %s597_s0 = inlined_call_operand.vmem [shape: f32[2,8,96], index: 0, kind: input, shape index: {}]   ;;  %s598_s1 = inlined_call_operand.vmem [shape: f32[2,8,32], index: 1, kind: output, shape index: {}]  }
   0x1 LB: > { %s447_s7 = sadd.s32 4294967295, %s512_s6   ;;  %p451_p0 = scmp.ge.s32.totalorder %s512_s6, 1  ;;  %s512_s6 = sphi %s538_s6, %s11_s6  }
   0x2   : > { %p86_p1 = scmp.lt.s32.totalorder %s512_s6, 3 }
   0x4   : > { %p87_p2 = pnand %p451_p0, %p86_p1 }
   0x5   : > { %p104_p3 = scmp.lt.s32.totalorder (!%p87_p2), %s447_s7, 1  ;;  %s514_s12 = smov (!%p87_p2), 96  }
   0x6   : > { %90 = sbr.rel (%p87_p2) target bundleno = 1170 (0x492), region = 24  ;;  %s515_s13 = smov (!%p87_p2), 88  }
   0x7   : > { %s516_s14 = smov (!%p87_p2), 120   ;;  %s517_s15 = smov (!%p87_p2), 64  }
   0x8   : > { %s518_s16 = smov (!%p87_p2), 80   ;;  %s519_s17 = smov (!%p87_p2), 72  }
   0x9   : > { %s520_s18 = smov (!%p87_p2), 112   ;;  %s521_s19 = smov (!%p87_p2), 104  }
   0xa   : > { %s522_s20 = smov (!%p87_p2), 48   ;;  %s523_s21 = smov (!%p87_p2), 56  }
   0xb   : > { %s600_s7 = smov (!%p104_p3, %s447_s7), 1  ;;  %vm117_vm0 = vcmask 64512   ;;  %s524_s22 = smov 40   ;;  %vm388_vm1 = vcmask 130048   ;;  %vm390_vm2 = vcmask 195584   ;;  %vm392_vm3 = vcmask 261120  }
   0xc   : > { %s452_s8 = sshll.u32 %s600_s7, 3  ;;  %s525_s23 = smov 24  }
   0xd   : > { %s107_s11 = scalar_lea.vmem %s597_s0, %s452_s8  ;;  %s526_s24 = smov 8  }
   0xe   : > { %v554_v0 = vld [vmem:[%s107_s11] sm:$0xff]  ;;  %s527_s25 = smov 16   ;;  %s111_s28 = scalar_lea.vmem %s598_s1, %s452_s8 }
   0xf   : > { %115 = vrot.lane.b32.xlu0 %v554_v0, %s514_s12  ;;  %182 = vrot.lane.b32.xlu1 %v554_v0, %s515_s13  ;;  %v113_v2 = vmul.f32 0.35355338, %v554_v0 }
  0x11   : > { %180 = vrot.lane.b32.xlu2 %v113_v2, %s516_s14 }
  0x19   : > { %154 = vrot.lane.b32.xlu2 %v554_v0, %s517_s15 }
  0x21   : > { %247 = vrot.lane.b32.xlu2 %v554_v0, %s518_s16 }
  0x29   : > { %312 = vrot.lane.b32.xlu2 %v554_v0, %s519_s17 }
  0x31   : > { %245 = vrot.lane.b32.xlu2 %v113_v2, %s520_s18 }
  0x6b   : > { %v181_v4 = vpop.permute.xlu2 %180 }
  0x73   : > { %v155_v10 = vpop.permute.xlu2 %154 }
  0x74   : > { %175 = vmatpush.msra.mxu1 %v155_v10 }
  0x7b   : > { %v248_v14 = vpop.permute.xlu2 %247 }
  0x7c   : > { %460 = vmatpush.xpose.msk.msrb.mxu1 %vm117_vm0, %v248_v14 }
  0x81   : > { %v116_v1 = vpop.permute.xlu0 %115  ;;  %v183_v3 = vpop.permute.xlu1 %182 }
  0x82   : > { %454 = vmatpush.xpose.msk.msra.mxu0 %vm117_vm0, %v116_v1  ;;  %457 = vmatpush.xpose.msk.msra.mxu2 %vm117_vm0, %v183_v3 }
  0x83   : > { %v313_v16 = vpop.permute.xlu2 %312 }
  0x85   : > { %455 = vmatmul.msk.f32.vlgmr.msra.gmra.mxu0 %vm117_vm0, %v113_v2  ;;  %458 = vmatmul.msk.f32.vlgmr.msra.gmra.mxu2 %vm117_vm0, %v181_v4 }
  0x86   : > { %463 = vmatpush.xpose.msk.msrb.mxu0 %vm117_vm0, %v313_v16 }
  0x8b   : > { %v246_v20 = vpop.permute.xlu2 %245 }
 0x102   : > { %v140_v5 = vpop.f32.mrf.mxu0 }
 0x103   : > { %v143_v6 = vsel %vm117_vm0, %v140_v5, -inf }
 0x104   : > { %144 = vmax.xlane.f32.xlu0 %v143_v6 }
 0x108   : > { %v205_v13 = vpop.f32.mrf.mxu2 }
 0x109   : > { %v208_v15 = vsel %vm117_vm0, %v205_v13, -inf }
 0x10a   : > { %209 = vmax.xlane.f32.xlu2 %v208_v15 }
 0x177   : > { %v145_v7 = vpop.xlane.xlu0 %144 }
 0x178   : > { %v146_v8 = vsub.f32 %v140_v5, %v145_v7 }
 0x17a   : > { %v147_v9 = vmul.f32 1.442695, %v146_v8 }
 0x17c   : > { %490 = vpow2.f32 %v147_v9 }
 0x17d   : > { %v210_v23 = vpop.xlane.xlu2 %209 }
 0x17e   : > { %v211_v24 = vsub.f32 %v205_v13, %v210_v23 }
 0x180   : > { %v212_v27 = vmul.f32 1.442695, %v211_v24 }
 0x182   : > { %v491_v11 = vpop.eup %490 }
 0x183   : > { %v149_v12 = vsel %vm117_vm0, %v491_v11, 0.0 }
 0x184   : > { %150 = vadd.xlane.f32.xlu1 %v149_v12 }
 0x19d   : > { %310 = vrot.lane.b32.xlu1 %v113_v2, %s521_s19 }
 0x1f7   : > { %v151_v17 = vpop.xlane.xlu1 %150 }
 0x1f8   : > { %492 = vrcp.f32 %v151_v17 }
 0x1f9   : > { %494 = vpow2.f32 %v212_v27 }
 0x1fe   : > { %v493_v18 = vpop.eup %492 }
 0x1ff   : > { %v153_v19 = vmul.f32 %v493_v18, %v491_v11  ;;  %v495_v30 = vpop.eup %494 }
 0x200   : > { %v214_v31 = vsel %vm117_vm0, %v495_v30, 0.0 }
 0x201   : > { %456 = vmatmul.msk.f32.vlgmr.msra.gmra.mxu1 %vm117_vm0, %v153_v19 }
 0x209   : > { %461 = vmatmul.msk.f32.vlgmr.msrb.gmra.mxu1 %vm117_vm0, %v246_v20 }
 0x20f   : > { %v311_v21 = vpop.permute.xlu1 %310 }
 0x210   : > { %464 = vmatmul.msk.f32.vlgmr.msrb.gmra.mxu0 %vm117_vm0, %v311_v21 }
 0x27e   : > { %v574_v22 = vpop.f32.mrf.mxu1 }
 0x286   : > { %v270_v25 = vpop.f32.mrf.mxu1 }
 0x287   : > { %v273_v26 = vsel %vm117_vm0, %v270_v25, -inf }
 0x288   : > { %274 = vmax.xlane.f32.xlu1 %v273_v26 }
 0x28d   : > { %v335_v28 = vpop.f32.mrf.mxu0 }
 0x28e   : > { %v338_v29 = vsel %vm117_vm0, %v335_v28, -inf }
 0x28f   : > { %339 = vmax.xlane.f32.xlu0 %v338_v29 }
 0x297   : > { %215 = vadd.xlane.f32.xlu0 %v214_v31 }
 0x2a1   : > { %284 = vrot.lane.b32.xlu1 %v554_v0, %s522_s20 }
 0x2fb   : > { %v275_v32 = vpop.xlane.xlu1 %274 }
 0x2fc   : > { %v276_v33 = vsub.f32 %v270_v25, %v275_v32 }
 0x2fe   : > { %v277_v34 = vmul.f32 1.442695, %v276_v33 }
 0x300   : > { %496 = vpow2.f32 %v277_v34 }
 0x302   : > { %v340_v35 = vpop.xlane.xlu0 %339 }
 0x303   : > { %v341_v36 = vsub.f32 %v335_v28, %v340_v35 }
 0x305   : > { %v342_v37 = vmul.f32 1.442695, %v341_v36 }
 0x306   : > { %v497_v38 = vpop.eup %496 }
 0x307   : > { %498 = vpow2.f32 %v342_v37  ;;  %v279_v39 = vsel %vm117_vm0, %v497_v38, 0.0 }
 0x308   : > { %280 = vadd.xlane.f32.xlu0 %v279_v39 }
 0x30a   : > { %v216_v42 = vpop.xlane.xlu0 %215 }
 0x30d   : > { %v499_v40 = vpop.eup %498 }
 0x30e   : > { %v344_v41 = vsel %vm117_vm0, %v499_v40, 0.0 }
 0x30f   : > { %345 = vadd.xlane.f32.xlu2 %v344_v41 }
 0x313   : > { %v285_v50 = vpop.permute.xlu1 %284 }
 0x31c   : > { %219 = vrot.lane.b32.xlu0 %v554_v0, %s523_s21 }
 0x327   : > { %349 = vrot.lane.b32.xlu2 %v554_v0, %s524_s22 }
 0x37b   : > { %v281_v44 = vpop.xlane.xlu0 %280 }
 0x382   : > { %v346_v43 = vpop.xlane.xlu2 %345 }
 0x383   : > { %500 = vrcp.f32 %v346_v43 }
 0x384   : > { %502 = vrcp.f32 %v216_v42 }
 0x385   : > { %504 = vrcp.f32 %v281_v44 }
 0x389   : > { %v501_v45 = vpop.eup %500 }
 0x38a   : > { %v350_v46 = vpop.permute.xlu2 %349  ;;  %v348_v47 = vmul.f32 %v501_v45, %v499_v40  ;;  %v503_v48 = vpop.eup %502 }
 0x38b   : > { %370 = vmatpush.msrb.mxu2 %v350_v46  ;;  %v218_v51 = vmul.f32 %v503_v48, %v495_v30  ;;  %v505_v52 = vpop.eup %504 }
 0x38c   : > { %465 = vmatmul.msk.f32.vlgmr.msrb.gmra.mxu2 %vm117_vm0, %v348_v47  ;;  %v283_v53 = vmul.f32 %v505_v52, %v497_v38 }
 0x38e   : > { %v220_v49 = vpop.permute.xlu0 %219 }
 0x38f   : > { %240 = vmatpush.msra.mxu3 %v220_v49 }
 0x390   : > { %459 = vmatmul.msk.f32.vlgmr.msra.gmra.mxu3 %vm117_vm0, %v218_v51 }
 0x391   : > { %305 = vmatpush.msrb.mxu3 %v285_v50 }
 0x398   : > { %462 = vmatmul.msk.f32.vlgmr.msrb.gmra.mxu3 %vm117_vm0, %v283_v53 }
 0x40f   : > { %v372_v54 = vpop.f32.mrf.mxu2 }
 0x410   : > { %384 = vrot.lane.b32.xlu1 %v372_v54, %s525_s23 }
 0x413   : > { %v242_v55 = vpop.f32.mrf.mxu3 }
 0x414   : > { %376 = vrot.lane.b32.xlu0 %v242_v55, %s526_s24 }
 0x41b   : > { %v307_v56 = vpop.f32.mrf.mxu3 }
 0x41c   : > { %380 = vrot.lane.b32.xlu0 %v307_v56, %s527_s25 }
 0x482   : > { %v385_v60 = vpop.permute.xlu1 %384 }
 0x486   : > { %v377_v57 = vpop.permute.xlu0 %376 }
 0x487   : > { %v387_v58 = vsel %vm117_vm0, %v574_v22, %v377_v57 }
 0x48e   : > { %v381_v59 = vpop.permute.xlu0 %380 }
 0x48f   : > { %v389_v61 = vsel %vm388_vm1, %v387_v58, %v381_v59 }
 0x490   : > { %v391_v62 = vsel %vm390_vm2, %v389_v61, %v385_v60 }
 0x491   : > { %393 = vst.msk [vmem:[%s111_s28] sm:$0xff] %vm392_vm3, %v391_v62 }
 0x492 PF: > { %s11_s6 = sadd.s32 1, %s512_s6  }
 0x493   : > { %p8_p4 = scmp.ge.s32.totalorder %s11_s6, 4  }
 0x495   :  { %10 = sbr.rel (!%p8_p4) target bundleno = 1 (0x1), region = 54 }

// kernel: transformer.13
= control target key start
LH: loop header
LB: loop body
LE: loop exit
PB: predicated region body
PF: predicated region fallthrough
CT: control target
= control target key end

     0   :  { %10 = vsyncpa [#allocation4], 0  ;;  %s451_s0 = inlined_call_operand.vmem [shape: f32[16,32], index: 0, kind: input, shape index: {}]   ;;  %s452_s1 = inlined_call_operand.hbm [shape: f32[1,32], index: 1, kind: input, shape index: {}]   ;;  %s453_s2 = inlined_call_operand.hbm [shape: f32[1,32], index: 2, kind: input, shape index: {}]   ;;  %s454_s3 = inlined_call_operand.hbm [shape: f32[32,128], index: 3, kind: input, shape index: {}]   ;;  %s455_s4 = inlined_call_operand.hbm [shape: f32[1,128], index: 4, kind: input, shape index: {}]   ;;  %s456_s5 = inlined_call_operand.vmem [shape: f32[16,128], index: 5, kind: output, shape index: {}]  }
   0x1   :  { %11 = vsyncpa [#allocation6], 0  ;;  %s31_s20 = sshll.u32 %s453_s2, 4  ;;  %s32_s20 = int_to_ptr.hbm [resolvable:$true] %s31_s20 }
   0x2   :  { %12 = vsyncpa [#allocation9], 0  ;;  %s384_s21 = smov [#allocation5]   ;;  %s20_s25 = sshll.u32 %s452_s1, 4  ;;  %s21_s25 = int_to_ptr.hbm [resolvable:$true] %s20_s25 }
   0x3   :  { %s33_s22 = sshll.u32 %s384_s21, 4  ;;  %s385_s26 = smov [#allocation3]   ;;  %s34_s22 = int_to_ptr.vmem [resolvable:$true] %s33_s22 }
   0x4   :  { %36 = dma.hbm_to_vmem [thread:$0]  %s32_s20, 16, %s34_s22, [#allocation6]  }
   0x5   :  { %s22_s27 = sshll.u32 %s385_s26, 4  ;;  %s41_s30 = sshll.u32 %s454_s3, 4  ;;  %s23_s27 = int_to_ptr.vmem [resolvable:$true] %s22_s27  ;;  %s42_s30 = int_to_ptr.hbm [resolvable:$true] %s41_s30 }
   0x6   :  { %25 = dma.hbm_to_vmem [thread:$0]  %s21_s25, 16, %s23_s27, [#allocation4]  }
   0x7   :  { %s386_s2 = smov [#allocation7]   ;;  %s55_s9 = sshll.u32 %s455_s4, 4  ;;  %s56_s9 = int_to_ptr.hbm [resolvable:$true] %s55_s9 }
   0x8   :  { %s43_s6 = sshll.u32 %s386_s2, 4  ;;  %s387_s10 = smov 128   ;;  %s44_s6 = int_to_ptr.vmem [resolvable:$true] %s43_s6 }
   0x9   :  { %s388_s1 = smov 8   ;;  %s389_s11 = smov [#allocation8]  }
   0xa   :  { %49 = dma.hbm_to_vmem [thread:$0]  %s42_s30, 512, %s44_s6, [#allocation6], %s387_s10, %s387_s10, %s388_s1  }
   0xb   :  { %s57_s12 = sshll.u32 %s389_s11, 4  ;;  %s58_s12 = int_to_ptr.vmem [resolvable:$true] %s57_s12 }
   0xc   :  { %60 = dma.hbm_to_vmem [thread:$0]  %s56_s9, 16, %s58_s12, [#allocation9]  }
   0xd   :  { %378 = dma.done.wait [#allocation4], 16  }
   0xe   :  { %379 = vsyncadd [#allocation4], 4294967280 }
   0xf   :  { %380 = dma.done.wait [#allocation6], 528  }
  0x10   :  { %381 = vsyncadd [#allocation6], 4294966768 }
  0x11   :  { %382 = dma.done.wait [#allocation9], 16  }
  0x12   :  { %383 = vsyncadd [#allocation9], 4294967280  ;;  %vm85_vm0 = vcmask 261120   ;;  %v83_v0 = vld [vmem:[%s451_s0] sm:$0xff]  ;;  %v84_v2 = vld [vmem:[%s451_s0 + $0x8] sm:$0xff]  ;;  %v390_v4 = vmov 32.0  }
  0x13   :  { %v86_v1 = vsel %vm85_vm0, %v83_v0, 0.0  ;;  %v89_v3 = vsel %vm85_vm0, %v84_v2, 0.0  ;;  %268 = vrcp.f32 %v390_v4  ;;  %v154_v21 = vld [vmem:[#allocation7 + $0x18] sm:$0xff]  ;;  %v153_v22 = vld [vmem:[#allocation7 + $0x10] sm:$0xff]  ;;  %v152_v23 = vld [vmem:[#allocation7 + $0x8] sm:$0xff] }
  0x14   :  { %87 = vadd.xlane.f32.xlu0 %v86_v1  ;;  %173 = vmatpush.msra.mxu0 %v154_v21  ;;  %v151_v24 = vld [vmem:[#allocation7] sm:$0xff]  ;;  %v265_v39 = vld [vmem:[#allocation3] ss:$0 sm:$0xff]  ;;  %v266_v43 = vld [vmem:[#allocation5] ss:$0 sm:$0xff] }
  0x15   :  { %254 = vmatpush.msra.mxu1 %v154_v21  ;;  %v267_v53 = vld [vmem:[#allocation8] ss:$0 sm:$0xff] }
  0x16   :  { %174 = vmatpush.msra.mxu0 %v153_v22 }
  0x17   :  { %255 = vmatpush.msra.mxu1 %v153_v22 }
  0x18   :  { %175 = vmatpush.msra.mxu0 %v152_v23 }
  0x19   :  { %v269_v5 = vpop.eup %268  ;;  %256 = vmatpush.msra.mxu1 %v152_v23 }
  0x1a   :  { %v93_v6 = vmul.f32 32.0, %v269_v5  ;;  %vm97_vm1 = vweird.f32 %v269_v5  ;;  %176 = vmatpush.msra.mxu0 %v151_v24 }
  0x1b   :  { %257 = vmatpush.msra.mxu1 %v151_v24 }
  0x1c   :  { %90 = vadd.xlane.f32.xlu0 %v89_v3  ;;  %v94_v7 = vsub.f32 1.0, %v93_v6 }
  0x1e   :  { %v95_v8 = vmul.f32 %v269_v5, %v94_v7 }
  0x20   :  { %v96_v9 = vadd.f32 %v269_v5, %v95_v8 }
  0x22   :  { %v98_v10 = vsel %vm97_vm1, %v269_v5, %v96_v9 }
  0x87   :  { %v88_v11 = vpop.xlane.xlu0 %87 }
  0x88   :  { %v99_v12 = vmul.f32 %v98_v10, %v88_v11 }
  0x8a   :  { %v101_v13 = vsub.f32 %v83_v0, %v99_v12 }
  0x8c   :  { %v103_v14 = vmul.f32 %v101_v13, %v101_v13 }
  0x8e   :  { %v105_v15 = vsel %vm85_vm0, %v103_v14, 0.0 }
  0x8f   :  { %106 = vadd.xlane.f32.xlu1 %v105_v15  ;;  %v91_v16 = vpop.xlane.xlu0 %90 }
  0x90   :  { %v100_v17 = vmul.f32 %v98_v10, %v91_v16 }
  0x92   :  { %v102_v18 = vsub.f32 %v84_v2, %v100_v17 }
  0x94   :  { %v104_v19 = vmul.f32 %v102_v18, %v102_v18 }
  0x96   :  { %v108_v20 = vsel %vm85_vm0, %v104_v19, 0.0 }
  0x97   :  { %109 = vadd.xlane.f32.xlu1 %v108_v20 }
 0x102   :  { %v107_v25 = vpop.xlane.xlu1 %106 }
 0x103   :  { %v111_v26 = vmul.f32 %v107_v25, %v98_v10 }
 0x105   :  { %v113_v27 = vadd.f32 1e-05, %v111_v26 }
 0x107   :  { %270 = vrsqrt.f32 %v113_v27  ;;  %vm121_vm3 = vweird.f32 %v113_v27 }
 0x10a   :  { %v110_v28 = vpop.xlane.xlu1 %109 }
 0x10b   :  { %v112_v29 = vmul.f32 %v110_v28, %v98_v10 }
 0x10d   :  { %v271_v30 = vpop.eup %270  ;;  %v114_v31 = vadd.f32 1e-05, %v112_v29 }
 0x10e   :  { %v116_v32 = vmul.f32 %v271_v30, %v113_v27  ;;  %vm122_vm2 = vweird.f32 %v271_v30 }
 0x10f   :  { %272 = vrsqrt.f32 %v114_v31  ;;  %vm123_vm4 = vmor %vm121_vm3, %vm122_vm2  ;;  %vm131_vm6 = vweird.f32 %v114_v31 }
 0x110   :  { %v117_v33 = vmul.f32 %v271_v30, %v116_v32 }
 0x112   :  { %v118_v34 = vmul.f32 0.5, %v117_v33 }
 0x114   :  { %v119_v35 = vsub.f32 1.5, %v118_v34 }
 0x115   :  { %v273_v36 = vpop.eup %272 }
 0x116   :  { %v120_v37 = vmul.f32 %v271_v30, %v119_v35  ;;  %v126_v38 = vmul.f32 %v273_v36, %v114_v31  ;;  %vm132_vm5 = vweird.f32 %v273_v36 }
 0x117   :  { %vm133_vm7 = vmor %vm131_vm6, %vm132_vm5 }
 0x118   :  { %v124_v40 = vsel %vm123_vm4, %v271_v30, %v120_v37  ;;  %v127_v41 = vmul.f32 %v273_v36, %v126_v38 }
 0x119   :  { %v135_v42 = vmul.f32 %v124_v40, %v101_v13 }
 0x11a   :  { %v128_v44 = vmul.f32 0.5, %v127_v41 }
 0x11b   :  { %v141_v45 = vmul.f32 %v265_v39, %v135_v42 }
 0x11c   :  { %v129_v46 = vsub.f32 1.5, %v128_v44 }
 0x11d   :  { %v147_v47 = vadd.f32 %v266_v43, %v141_v45 }
 0x11e   :  { %v130_v48 = vmul.f32 %v273_v36, %v129_v46 }
 0x11f   :  { %250 = vmatmul.msk.f32.vlgmr.msra.gmra.mxu0 %vm85_vm0, %v147_v47 }
 0x120   :  { %v134_v49 = vsel %vm133_vm7, %v273_v36, %v130_v48 }
 0x121   :  { %v136_v50 = vmul.f32 %v134_v49, %v102_v18 }
 0x123   :  { %v142_v51 = vmul.f32 %v265_v39, %v136_v50 }
 0x125   :  { %v148_v52 = vadd.f32 %v266_v43, %v142_v51 }
 0x127   :  { %251 = vmatmul.msk.f32.vlgmr.msra.gmra.mxu1 %vm85_vm0, %v148_v52 }
 0x19c   :  { %v178_v54 = vpop.f32.mrf.mxu0 }
 0x19d   :  { %v197_v55 = vadd.f32 %v267_v53, %v178_v54 }
 0x19f   :  { %v252_v56 = vmul.f32 -1.702, %v197_v55 }
 0x1a1   :  { %v203_v57 = vmul.f32 1.442695, %v252_v56 }
 0x1a3   :  { %274 = vpow2.f32 %v203_v57 }
 0x1a4   :  { %v181_v58 = vpop.f32.mrf.mxu1 }
 0x1a5   :  { %v198_v59 = vadd.f32 %v267_v53, %v181_v58 }
 0x1a7   :  { %v253_v60 = vmul.f32 -1.702, %v198_v59 }
 0x1a9   :  { %v275_v61 = vpop.eup %274  ;;  %v205_v62 = vmul.f32 1.442695, %v253_v60 }
 0x1aa   :  { %v207_v63 = vadd.f32 1.0, %v275_v61 }
 0x1ab   :  { %276 = vpow2.f32 %v205_v62 }
 0x1ac   :  { %278 = vrcp.f32 %v207_v63  ;;  %v220_v5 = vand.u32 2147483648, %v207_v63  ;;  %v218_v7 = vand.u32 2147483647, %v207_v63  ;;  %vm214_vm9 = vweird.f32 %v207_v63 }
 0x1ae   :  { %v221_v10 = vor.u32 1.1754944e-38, %v220_v5  ;;  %vm219_vm11 = vcmp.eq.f32.partialorder %v218_v7, 8.507059e+37 }
 0x1b1   :  { %v277_v0 = vpop.eup %276 }
 0x1b2   :  { %v279_v1 = vpop.eup %278  ;;  %v208_v2 = vadd.f32 1.0, %v277_v0 }
 0x1b3   :  { %v210_v3 = vmul.f32 %v279_v1, %v207_v63  ;;  %vm215_vm8 = vweird.f32 %v279_v1 }
 0x1b4   :  { %280 = vrcp.f32 %v208_v2  ;;  %vm216_vm10 = vmor %vm214_vm9, %vm215_vm8  ;;  %v235_v16 = vand.u32 2147483648, %v208_v2  ;;  %v233_v18 = vand.u32 2147483647, %v208_v2  ;;  %vm229_vm13 = vweird.f32 %v208_v2 }
 0x1b5   :  { %v211_v4 = vsub.f32 1.0, %v210_v3 }
 0x1b6   :  { %v236_v20 = vor.u32 1.1754944e-38, %v235_v16  ;;  %vm234_vm15 = vcmp.eq.f32.partialorder %v233_v18, 8.507059e+37 }
 0x1b7   :  { %v212_v6 = vmul.f32 %v279_v1, %v211_v4 }
 0x1b9   :  { %v213_v8 = vadd.f32 %v279_v1, %v212_v6 }
 0x1ba   :  { %v281_v9 = vpop.eup %280 }
 0x1bb   :  { %v217_v11 = vsel %vm216_vm10, %v279_v1, %v213_v8  ;;  %v225_v12 = vmul.f32 %v281_v9, %v208_v2  ;;  %vm230_vm12 = vweird.f32 %v281_v9 }
 0x1bc   :  { %v222_v13 = vsel %vm219_vm11, %v221_v10, %v217_v11  ;;  %vm231_vm14 = vmor %vm229_vm13, %vm230_vm12 }
 0x1bd   :  { %v239_v14 = vmul.f32 %v222_v13, %v197_v55  ;;  %v226_v15 = vsub.f32 1.0, %v225_v12 }
 0x1bf   :  { %241 = vst [vmem:[%s456_s5] sm:$0xff] %v239_v14  ;;  %v227_v17 = vmul.f32 %v281_v9, %v226_v15 }
 0x1c1   :  { %v228_v19 = vadd.f32 %v281_v9, %v227_v17 }
 0x1c3   :  { %v232_v21 = vsel %vm231_vm14, %v281_v9, %v228_v19 }
 0x1c4   :  { %v237_v22 = vsel %vm234_vm15, %v236_v20, %v232_v21 }
 0x1c5   :  { %v240_v23 = vmul.f32 %v237_v22, %v198_v59 }
 0x1c7   :  { %242 = vst [vmem:[%s456_s5 + $0x8] sm:$0xff] %v240_v23 }
 0x1c8   :  { %247 = vsyncpa [#allocation4], 1 }
 0x1c9   :  { %248 = vsyncpa [#allocation6], 1 }
 0x1ca   :  { %249 = vsyncpa [#allocation9], 1 }

// kernel: transformer.14
= control target key start
LH: loop header
LB: loop body
LE: loop exit
PB: predicated region body
PF: predicated region fallthrough
CT: control target
= control target key end

     0   :  { %vm21_vm0 = vcmask 261120   ;;  %v111_v2 = vmov 0.0   ;;  %s212_s1 = inlined_call_operand.vmem [shape: f32[128,32], index: 1, kind: input, shape index: {}]   ;;  %s213_s2 = inlined_call_operand.vmem [shape: f32[1,32], index: 2, kind: input, shape index: {}]   ;;  %s214_s0 = inlined_call_operand.vmem [shape: f32[16,128], index: 0, kind: input, shape index: {}]   ;;  %s215_s3 = inlined_call_operand.vmem [shape: f32[16,32], index: 3, kind: input, shape index: {}]   ;;  %s216_s4 = inlined_call_operand.vmem [shape: f32[16,32], index: 4, kind: output, shape index: {}]  }
   0x1   :  { %v43_v0 = vld [vmem:[%s212_s1 + $0x78] sm:$0xff]  ;;  %v42_v1 = vld [vmem:[%s212_s1 + $0x70] sm:$0xff]  ;;  %22 = vst.msk [vmem:[#allocation2] sm:$0xff] %vm21_vm0, %v111_v2  ;;  %v41_v3 = vld [vmem:[%s212_s1 + $0x68] sm:$0xff] }
   0x2   :  { %44 = vmatpush.msra.mxu0 %v43_v0  ;;  %93 = vmatpush.msra.mxu1 %v43_v0  ;;  %23 = vst.msk [vmem:[#allocation2 + $0x8] sm:$0xff] %vm21_vm0, %v111_v2  ;;  %v40_v4 = vld [vmem:[%s212_s1 + $0x60] sm:$0xff]  ;;  %v39_v5 = vld [vmem:[%s212_s1 + $0x58] sm:$0xff]  ;;  %v38_v6 = vld [vmem:[%s212_s1 + $0x50] sm:$0xff] }
   0x3   :  { %v37_v7 = vld [vmem:[%s212_s1 + $0x48] sm:$0xff]  ;;  %v36_v8 = vld [vmem:[%s212_s1 + $0x40] sm:$0xff]  ;;  %v35_v9 = vld [vmem:[%s212_s1 + $0x38] sm:$0xff] }
   0x4   :  { %45 = vmatpush.msra.mxu0 %v42_v1  ;;  %94 = vmatpush.msra.mxu1 %v42_v1  ;;  %v34_v10 = vld [vmem:[%s212_s1 + $0x30] sm:$0xff]  ;;  %v33_v11 = vld [vmem:[%s212_s1 + $0x28] sm:$0xff]  ;;  %v32_v12 = vld [vmem:[%s212_s1 + $0x20] sm:$0xff] }
   0x5   :  { %v31_v13 = vld [vmem:[%s212_s1 + $0x18] sm:$0xff]  ;;  %v30_v14 = vld [vmem:[%s212_s1 + $0x10] sm:$0xff]  ;;  %v29_v15 = vld [vmem:[%s212_s1 + $0x8] sm:$0xff] }
   0x6   :  { %46 = vmatpush.msra.mxu0 %v41_v3  ;;  %95 = vmatpush.msra.mxu1 %v41_v3  ;;  %v28_v16 = vld [vmem:[%s212_s1] sm:$0xff]  ;;  %v25_v18 = vld [vmem:[%s214_s0 + $0x8] sm:$0xff] }
   0x7   :  { %v24_v17 = vld [vmem:[%s214_s0] sm:$0xff]  ;;  %v84_v29 = vld [vmem:[%s215_s3 + $0x8] sm:$0xff] }
   0x8   :  { %47 = vmatpush.msra.mxu0 %v40_v4  ;;  %96 = vmatpush.msra.mxu1 %v40_v4  ;;  %v26_v19 = vld [vmem:[#allocation2] sm:$0xff] }
   0x9   :  { %v27_v20 = vld [vmem:[#allocation2 + $0x8] sm:$0xff]  ;;  %v110_v25 = vld [vmem:[%s213_s2] ss:$0 sm:$0xff] }
   0xa   :  { %48 = vmatpush.msra.mxu0 %v39_v5  ;;  %97 = vmatpush.msra.mxu1 %v39_v5  ;;  %v83_v27 = vld [vmem:[%s215_s3] sm:$0xff] }
   0xc   :  { %49 = vmatpush.msra.mxu0 %v38_v6  ;;  %98 = vmatpush.msra.mxu1 %v38_v6 }
   0xe   :  { %50 = vmatpush.msra.mxu0 %v37_v7  ;;  %99 = vmatpush.msra.mxu1 %v37_v7 }
  0x10   :  { %51 = vmatpush.msra.mxu0 %v36_v8  ;;  %100 = vmatpush.msra.mxu1 %v36_v8 }
  0x12   :  { %52 = vmatpush.msra.mxu0 %v35_v9  ;;  %101 = vmatpush.msra.mxu1 %v35_v9 }
  0x14   :  { %53 = vmatpush.msra.mxu0 %v34_v10  ;;  %102 = vmatpush.msra.mxu1 %v34_v10 }
  0x16   :  { %54 = vmatpush.msra.mxu0 %v33_v11  ;;  %103 = vmatpush.msra.mxu1 %v33_v11 }
  0x18   :  { %55 = vmatpush.msra.mxu0 %v32_v12  ;;  %104 = vmatpush.msra.mxu1 %v32_v12 }
  0x1a   :  { %56 = vmatpush.msra.mxu0 %v31_v13  ;;  %105 = vmatpush.msra.mxu1 %v31_v13 }
  0x1c   :  { %57 = vmatpush.msra.mxu0 %v30_v14  ;;  %106 = vmatpush.msra.mxu1 %v30_v14 }
  0x1e   :  { %58 = vmatpush.msra.mxu0 %v29_v15  ;;  %107 = vmatpush.msra.mxu1 %v29_v15 }
  0x20   :  { %59 = vmatpush.msra.mxu0 %v28_v16  ;;  %108 = vmatpush.msra.mxu1 %v28_v16 }
  0x21   :  { %60 = vmatmul.f32.vlgmr.msra.gmra.mxu0 %v24_v17  ;;  %63 = vmatmul.f32.vlgmr.msra.gmra.mxu1 %v25_v18 }
  0x9e   :  { %v61_v21 = vpop.f32.mrf.mxu0  ;;  %v64_v22 = vpop.f32.mrf.mxu1 }
  0x9f   :  { %v67_v23 = vadd.f32 %v61_v21, %v26_v19  ;;  %v68_v24 = vadd.f32 %v64_v22, %v27_v20 }
  0xa1   :  { %70 = vst.msk [vmem:[#allocation2] sm:$0xff] %vm21_vm0, %v67_v23 }
  0xa2   :  { %71 = vst.msk [vmem:[#allocation2 + $0x8] sm:$0xff] %vm21_vm0, %v68_v24 }
  0xa8   :  { %v75_v26 = vld [vmem:[#allocation2] sm:$0xff] }
  0xa9   :  { %v81_v28 = vadd.f32 %v110_v25, %v75_v26  ;;  %v76_v30 = vld [vmem:[#allocation2 + $0x8] sm:$0xff] }
  0xaa   :  { %v82_v31 = vadd.f32 %v110_v25, %v76_v30 }
  0xab   :  { %v85_v32 = vadd.f32 %v83_v27, %v81_v28 }
  0xac   :  { %v86_v33 = vadd.f32 %v84_v29, %v82_v31 }
  0xad   :  { %87 = vst.msk [vmem:[%s216_s4] sm:$0xff] %vm21_vm0, %v85_v32 }
  0xae   :  { %88 = vst.msk [vmem:[%s216_s4 + $0x8] sm:$0xff] %vm21_vm0, %v86_v33 }

// kernel: transformer.15
= control target key start
LH: loop header
LB: loop body
LE: loop exit
PB: predicated region body
PF: predicated region fallthrough
CT: control target
= control target key end

     0   :  { %vm29_vm0 = vcmask 261120   ;;  %v167_v4 = vmov 32.0   ;;  %vm24_vm2 = vcmask 785408   ;;  %v168_v28 = vmov 0.0   ;;  %s244_s0 = inlined_call_operand.vmem [shape: f32[16,32], index: 0, kind: input, shape index: {}]   ;;  %s245_s1 = inlined_call_operand.vmem [shape: f32[1,32], index: 1, kind: input, shape index: {}]   ;;  %s246_s2 = inlined_call_operand.vmem [shape: f32[1,32], index: 2, kind: input, shape index: {}]   ;;  %s247_s4 = inlined_call_operand.vmem [shape: f32[1,96], index: 4, kind: input, shape index: {}]   ;;  %s248_s3 = inlined_call_operand.vmem [shape: f32[32,96], index: 3, kind: input, shape index: {}]   ;;  %s249_s5 = inlined_call_operand.vmem [shape: f32[16,96], index: 5, kind: output, shape index: {}]  }
   0x1   :  { %v27_v0 = vld [vmem:[%s244_s0] sm:$0xff]  ;;  %v28_v2 = vld [vmem:[%s244_s0 + $0x8] sm:$0xff]  ;;  %161 = vrcp.f32 %v167_v4  ;;  %v98_v21 = vld [vmem:[%s248_s3 + $0x18] sm:$0xff]  ;;  %25 = vst.msk [vmem:[#allocation2] sm:$0xff] %vm24_vm2, %v168_v28 }
   0x2   :  { %v30_v1 = vsel %vm29_vm0, %v27_v0, 0.0  ;;  %v33_v3 = vsel %vm29_vm0, %v28_v2, 0.0  ;;  %117 = vmatpush.msra.mxu0 %v98_v21  ;;  %152 = vmatpush.msra.mxu1 %v98_v21  ;;  %v97_v22 = vld [vmem:[%s248_s3 + $0x10] sm:$0xff]  ;;  %v96_v23 = vld [vmem:[%s248_s3 + $0x8] sm:$0xff]  ;;  %v95_v24 = vld [vmem:[%s248_s3] sm:$0xff]  ;;  %26 = vst.msk [vmem:[#allocation2 + $0x8] sm:$0xff] %vm24_vm2, %v168_v28 }
   0x3   :  { %31 = vadd.xlane.f32.xlu0 %v30_v1  ;;  %v158_v40 = vld [vmem:[%s245_s1] ss:$0 sm:$0xff] }
   0x4   :  { %118 = vmatpush.msra.mxu0 %v97_v22  ;;  %153 = vmatpush.msra.mxu1 %v97_v22  ;;  %v159_v44 = vld [vmem:[%s246_s2] ss:$0 sm:$0xff] }
   0x5   :  { %v160_v58 = vld [vmem:[%s247_s4] ss:$0 sm:$0xff] }
   0x6   :  { %119 = vmatpush.msra.mxu0 %v96_v23  ;;  %154 = vmatpush.msra.mxu1 %v96_v23 }
   0x7   :  { %v162_v5 = vpop.eup %161 }
   0x8   :  { %v37_v6 = vmul.f32 32.0, %v162_v5  ;;  %vm41_vm1 = vweird.f32 %v162_v5  ;;  %120 = vmatpush.msra.mxu0 %v95_v24  ;;  %155 = vmatpush.msra.mxu1 %v95_v24  ;;  %v93_v54 = vld [vmem:[#allocation2] sm:$0xff] }
   0x9   :  { %v94_v57 = vld [vmem:[#allocation2 + $0x8] sm:$0xff] }
   0xa   :  { %v38_v7 = vsub.f32 1.0, %v37_v6 }
   0xb   :  { %34 = vadd.xlane.f32.xlu0 %v33_v3 }
   0xc   :  { %v39_v8 = vmul.f32 %v162_v5, %v38_v7 }
   0xe   :  { %v40_v9 = vadd.f32 %v162_v5, %v39_v8 }
  0x10   :  { %v42_v10 = vsel %vm41_vm1, %v162_v5, %v40_v9 }
  0x76   :  { %v32_v11 = vpop.xlane.xlu0 %31 }
  0x77   :  { %v43_v12 = vmul.f32 %v42_v10, %v32_v11 }
  0x79   :  { %v45_v13 = vsub.f32 %v27_v0, %v43_v12 }
  0x7b   :  { %v47_v14 = vmul.f32 %v45_v13, %v45_v13 }
  0x7d   :  { %v49_v15 = vsel %vm29_vm0, %v47_v14, 0.0 }
  0x7e   :  { %50 = vadd.xlane.f32.xlu1 %v49_v15  ;;  %v35_v16 = vpop.xlane.xlu0 %34 }
  0x7f   :  { %v44_v17 = vmul.f32 %v42_v10, %v35_v16 }
  0x81   :  { %v46_v18 = vsub.f32 %v28_v2, %v44_v17 }
  0x83   :  { %v48_v19 = vmul.f32 %v46_v18, %v46_v18 }
  0x85   :  { %v52_v20 = vsel %vm29_vm0, %v48_v19, 0.0 }
  0x86   :  { %53 = vadd.xlane.f32.xlu1 %v52_v20 }
  0xf1   :  { %v51_v25 = vpop.xlane.xlu1 %50 }
  0xf2   :  { %v55_v26 = vmul.f32 %v51_v25, %v42_v10 }
  0xf4   :  { %v57_v27 = vadd.f32 1e-05, %v55_v26 }
  0xf6   :  { %163 = vrsqrt.f32 %v57_v27  ;;  %vm65_vm4 = vweird.f32 %v57_v27 }
  0xf9   :  { %v54_v29 = vpop.xlane.xlu1 %53 }
  0xfa   :  { %v56_v30 = vmul.f32 %v54_v29, %v42_v10 }
  0xfc   :  { %v164_v31 = vpop.eup %163  ;;  %v58_v32 = vadd.f32 1e-05, %v56_v30 }
  0xfd   :  { %v60_v33 = vmul.f32 %v164_v31, %v57_v27  ;;  %vm66_vm3 = vweird.f32 %v164_v31 }
  0xfe   :  { %165 = vrsqrt.f32 %v58_v32  ;;  %vm67_vm5 = vmor %vm65_vm4, %vm66_vm3  ;;  %vm75_vm7 = vweird.f32 %v58_v32 }
  0xff   :  { %v61_v34 = vmul.f32 %v164_v31, %v60_v33 }
 0x101   :  { %v62_v35 = vmul.f32 0.5, %v61_v34 }
 0x103   :  { %v63_v36 = vsub.f32 1.5, %v62_v35 }
 0x104   :  { %v166_v37 = vpop.eup %165 }
 0x105   :  { %v64_v38 = vmul.f32 %v164_v31, %v63_v36  ;;  %v70_v39 = vmul.f32 %v166_v37, %v58_v32  ;;  %vm76_vm6 = vweird.f32 %v166_v37 }
 0x106   :  { %vm77_vm8 = vmor %vm75_vm7, %vm76_vm6 }
 0x107   :  { %v68_v41 = vsel %vm67_vm5, %v164_v31, %v64_v38  ;;  %v71_v42 = vmul.f32 %v166_v37, %v70_v39 }
 0x108   :  { %v79_v43 = vmul.f32 %v68_v41, %v45_v13 }
 0x109   :  { %v72_v45 = vmul.f32 0.5, %v71_v42 }
 0x10a   :  { %v85_v46 = vmul.f32 %v158_v40, %v79_v43 }
 0x10b   :  { %v73_v47 = vsub.f32 1.5, %v72_v45 }
 0x10c   :  { %v91_v48 = vadd.f32 %v159_v44, %v85_v46 }
 0x10d   :  { %v74_v49 = vmul.f32 %v166_v37, %v73_v47 }
 0x10e   :  { %150 = vmatmul.msk.f32.vlgmr.msra.gmra.mxu0 %vm29_vm0, %v91_v48 }
 0x10f   :  { %v78_v50 = vsel %vm77_vm8, %v166_v37, %v74_v49 }
 0x110   :  { %v80_v51 = vmul.f32 %v78_v50, %v46_v18 }
 0x112   :  { %v86_v52 = vmul.f32 %v158_v40, %v80_v51 }
 0x114   :  { %v92_v53 = vadd.f32 %v159_v44, %v86_v52 }
 0x116   :  { %151 = vmatmul.msk.f32.vlgmr.msra.gmra.mxu1 %vm29_vm0, %v92_v53 }
 0x18b   :  { %v122_v55 = vpop.f32.mrf.mxu0 }
 0x18c   :  { %v128_v56 = vadd.f32 %v122_v55, %v93_v54 }
 0x18e   :  { %131 = vst.msk [vmem:[#allocation2] sm:$0xff] %vm24_vm2, %v128_v56 }
 0x193   :  { %v125_v59 = vpop.f32.mrf.mxu1 }
 0x194   :  { %v129_v60 = vadd.f32 %v125_v59, %v94_v57 }
 0x195   :  { %v136_v61 = vld [vmem:[#allocation2] sm:$0xff] }
 0x196   :  { %v142_v62 = vadd.f32 %v160_v58, %v136_v61  ;;  %132 = vst.msk [vmem:[#allocation2 + $0x8] sm:$0xff] %vm24_vm2, %v129_v60 }
 0x198   :  { %144 = vst.msk [vmem:[%s249_s5] sm:$0xff] %vm24_vm2, %v142_v62 }
 0x19d   :  { %v137_v63 = vld [vmem:[#allocation2 + $0x8] sm:$0xff] }
 0x19e   :  { %v143_v0 = vadd.f32 %v160_v58, %v137_v63 }
 0x1a0   :  { %145 = vst.msk [vmem:[%s249_s5 + $0x8] sm:$0xff] %vm24_vm2, %v143_v0 }

// kernel: transformer.17
= control target key start
LH: loop header
LB: loop body
LE: loop exit
PB: predicated region body
PF: predicated region fallthrough
CT: control target
= control target key end

     0   :  { %vm21_vm0 = vcmask 261120   ;;  %v95_v2 = vmov 0.0   ;;  %s162_s1 = inlined_call_operand.vmem [shape: f32[32,32], index: 1, kind: input, shape index: {}]   ;;  %s163_s2 = inlined_call_operand.vmem [shape: f32[1,32], index: 2, kind: input, shape index: {}]   ;;  %s164_s0 = inlined_call_operand.vmem [shape: f32[16,32], index: 0, kind: input, shape index: {}]   ;;  %s165_s3 = inlined_call_operand.vmem [shape: f32[16,32], index: 3, kind: input, shape index: {}]   ;;  %s166_s4 = inlined_call_operand.vmem [shape: f32[16,32], index: 4, kind: output, shape index: {}]  }
   0x1   :  { %v31_v0 = vld [vmem:[%s162_s1 + $0x18] sm:$0xff]  ;;  %v30_v1 = vld [vmem:[%s162_s1 + $0x10] sm:$0xff]  ;;  %22 = vst.msk [vmem:[#allocation2] sm:$0xff] %vm21_vm0, %v95_v2  ;;  %v29_v3 = vld [vmem:[%s162_s1 + $0x8] sm:$0xff] }
   0x2   :  { %51 = vmatpush.msra.mxu0 %v31_v0  ;;  %89 = vmatpush.msra.mxu1 %v31_v0  ;;  %23 = vst.msk [vmem:[#allocation2 + $0x8] sm:$0xff] %vm21_vm0, %v95_v2  ;;  %v28_v4 = vld [vmem:[%s162_s1] sm:$0xff]  ;;  %v25_v6 = vld [vmem:[%s164_s0 + $0x8] sm:$0xff] }
   0x3   :  { %v24_v5 = vld [vmem:[%s164_s0] sm:$0xff]  ;;  %v78_v18 = vld [vmem:[%s165_s3 + $0x8] sm:$0xff] }
   0x4   :  { %52 = vmatpush.msra.mxu0 %v30_v1  ;;  %90 = vmatpush.msra.mxu1 %v30_v1  ;;  %v94_v13 = vld [vmem:[%s163_s2] ss:$0 sm:$0xff] }
   0x5   :  { %v77_v15 = vld [vmem:[%s165_s3] sm:$0xff] }
   0x6   :  { %53 = vmatpush.msra.mxu0 %v29_v3  ;;  %91 = vmatpush.msra.mxu1 %v29_v3 }
   0x8   :  { %54 = vmatpush.msra.mxu0 %v28_v4  ;;  %92 = vmatpush.msra.mxu1 %v28_v4  ;;  %v26_v7 = vld [vmem:[#allocation2] sm:$0xff] }
   0x9   :  { %87 = vmatmul.msk.f32.vlgmr.msra.gmra.mxu0 %vm21_vm0, %v24_v5  ;;  %88 = vmatmul.msk.f32.vlgmr.msra.gmra.mxu1 %vm21_vm0, %v25_v6  ;;  %v27_v8 = vld [vmem:[#allocation2 + $0x8] sm:$0xff] }
  0x86   :  { %v56_v9 = vpop.f32.mrf.mxu0  ;;  %v59_v10 = vpop.f32.mrf.mxu1 }
  0x87   :  { %v62_v11 = vadd.f32 %v56_v9, %v26_v7  ;;  %v63_v12 = vadd.f32 %v59_v10, %v27_v8 }
  0x89   :  { %64 = vst.msk [vmem:[#allocation2] sm:$0xff] %vm21_vm0, %v62_v11 }
  0x8a   :  { %65 = vst.msk [vmem:[#allocation2 + $0x8] sm:$0xff] %vm21_vm0, %v63_v12 }
  0x90   :  { %v69_v14 = vld [vmem:[#allocation2] sm:$0xff] }
  0x91   :  { %v75_v16 = vadd.f32 %v94_v13, %v69_v14  ;;  %v70_v17 = vld [vmem:[#allocation2 + $0x8] sm:$0xff] }
  0x92   :  { %v76_v19 = vadd.f32 %v94_v13, %v70_v17 }
  0x93   :  { %v79_v20 = vadd.f32 %v77_v15, %v75_v16 }
  0x94   :  { %v80_v21 = vadd.f32 %v78_v18, %v76_v19 }
  0x95   :  { %81 = vst.msk [vmem:[%s166_s4] sm:$0xff] %vm21_vm0, %v79_v20 }
  0x96   :  { %82 = vst.msk [vmem:[%s166_s4 + $0x8] sm:$0xff] %vm21_vm0, %v80_v21 }

// kernel: transformer.18
= control target key start
LH: loop header
LB: loop body
LE: loop exit
PB: predicated region body
PF: predicated region fallthrough
CT: control target
= control target key end

     0   :  { %vm28_vm0 = vcmask 261120   ;;  %v216_v4 = vmov 32.0   ;;  %s286_s0 = inlined_call_operand.vmem [shape: f32[16,32], index: 0, kind: input, shape index: {}]   ;;  %s287_s1 = inlined_call_operand.vmem [shape: f32[1,32], index: 1, kind: input, shape index: {}]   ;;  %s288_s2 = inlined_call_operand.vmem [shape: f32[1,32], index: 2, kind: input, shape index: {}]   ;;  %s289_s4 = inlined_call_operand.vmem [shape: f32[1,128], index: 4, kind: input, shape index: {}]   ;;  %s290_s3 = inlined_call_operand.vmem [shape: f32[32,128], index: 3, kind: input, shape index: {}]   ;;  %s291_s5 = inlined_call_operand.vmem [shape: f32[16,128], index: 5, kind: output, shape index: {}]  }
   0x1   :  { %v26_v0 = vld [vmem:[%s286_s0] sm:$0xff]  ;;  %v27_v2 = vld [vmem:[%s286_s0 + $0x8] sm:$0xff]  ;;  %202 = vrcp.f32 %v216_v4  ;;  %v97_v21 = vld [vmem:[%s290_s3 + $0x18] sm:$0xff] }
   0x2   :  { %v29_v1 = vsel %vm28_vm0, %v26_v0, 0.0  ;;  %v32_v3 = vsel %vm28_vm0, %v27_v2, 0.0  ;;  %116 = vmatpush.msra.mxu0 %v97_v21  ;;  %194 = vmatpush.msra.mxu1 %v97_v21  ;;  %v96_v22 = vld [vmem:[%s290_s3 + $0x10] sm:$0xff]  ;;  %v95_v23 = vld [vmem:[%s290_s3 + $0x8] sm:$0xff]  ;;  %v94_v24 = vld [vmem:[%s290_s3] sm:$0xff] }
   0x3   :  { %30 = vadd.xlane.f32.xlu0 %v29_v1  ;;  %v199_v39 = vld [vmem:[%s287_s1] ss:$0 sm:$0xff] }
   0x4   :  { %117 = vmatpush.msra.mxu0 %v96_v22  ;;  %195 = vmatpush.msra.mxu1 %v96_v22  ;;  %v200_v43 = vld [vmem:[%s288_s2] ss:$0 sm:$0xff] }
   0x5   :  { %v201_v53 = vld [vmem:[%s289_s4] ss:$0 sm:$0xff] }
   0x6   :  { %118 = vmatpush.msra.mxu0 %v95_v23  ;;  %196 = vmatpush.msra.mxu1 %v95_v23 }
   0x7   :  { %v203_v5 = vpop.eup %202 }
   0x8   :  { %v36_v6 = vmul.f32 32.0, %v203_v5  ;;  %vm40_vm1 = vweird.f32 %v203_v5  ;;  %119 = vmatpush.msra.mxu0 %v94_v24  ;;  %197 = vmatpush.msra.mxu1 %v94_v24 }
   0xa   :  { %v37_v7 = vsub.f32 1.0, %v36_v6 }
   0xb   :  { %33 = vadd.xlane.f32.xlu0 %v32_v3 }
   0xc   :  { %v38_v8 = vmul.f32 %v203_v5, %v37_v7 }
   0xe   :  { %v39_v9 = vadd.f32 %v203_v5, %v38_v8 }
  0x10   :  { %v41_v10 = vsel %vm40_vm1, %v203_v5, %v39_v9 }
  0x76   :  { %v31_v11 = vpop.xlane.xlu0 %30 }
  0x77   :  { %v42_v12 = vmul.f32 %v41_v10, %v31_v11 }
  0x79   :  { %v44_v13 = vsub.f32 %v26_v0, %v42_v12 }
  0x7b   :  { %v46_v14 = vmul.f32 %v44_v13, %v44_v13 }
  0x7d   :  { %v48_v15 = vsel %vm28_vm0, %v46_v14, 0.0 }
  0x7e   :  { %49 = vadd.xlane.f32.xlu1 %v48_v15  ;;  %v34_v16 = vpop.xlane.xlu0 %33 }
  0x7f   :  { %v43_v17 = vmul.f32 %v41_v10, %v34_v16 }
  0x81   :  { %v45_v18 = vsub.f32 %v27_v2, %v43_v17 }
  0x83   :  { %v47_v19 = vmul.f32 %v45_v18, %v45_v18 }
  0x85   :  { %v51_v20 = vsel %vm28_vm0, %v47_v19, 0.0 }
  0x86   :  { %52 = vadd.xlane.f32.xlu1 %v51_v20 }
  0xf1   :  { %v50_v25 = vpop.xlane.xlu1 %49 }
  0xf2   :  { %v54_v26 = vmul.f32 %v50_v25, %v41_v10 }
  0xf4   :  { %v56_v27 = vadd.f32 1e-05, %v54_v26 }
  0xf6   :  { %204 = vrsqrt.f32 %v56_v27  ;;  %vm64_vm3 = vweird.f32 %v56_v27 }
  0xf9   :  { %v53_v28 = vpop.xlane.xlu1 %52 }
  0xfa   :  { %v55_v29 = vmul.f32 %v53_v28, %v41_v10 }
  0xfc   :  { %v205_v30 = vpop.eup %204  ;;  %v57_v31 = vadd.f32 1e-05, %v55_v29 }
  0xfd   :  { %v59_v32 = vmul.f32 %v205_v30, %v56_v27  ;;  %vm65_vm2 = vweird.f32 %v205_v30 }
  0xfe   :  { %206 = vrsqrt.f32 %v57_v31  ;;  %vm66_vm4 = vmor %vm64_vm3, %vm65_vm2  ;;  %vm74_vm6 = vweird.f32 %v57_v31 }
  0xff   :  { %v60_v33 = vmul.f32 %v205_v30, %v59_v32 }
 0x101   :  { %v61_v34 = vmul.f32 0.5, %v60_v33 }
 0x103   :  { %v62_v35 = vsub.f32 1.5, %v61_v34 }
 0x104   :  { %v207_v36 = vpop.eup %206 }
 0x105   :  { %v63_v37 = vmul.f32 %v205_v30, %v62_v35  ;;  %v69_v38 = vmul.f32 %v207_v36, %v57_v31  ;;  %vm75_vm5 = vweird.f32 %v207_v36 }
 0x106   :  { %vm76_vm7 = vmor %vm74_vm6, %vm75_vm5 }
 0x107   :  { %v67_v40 = vsel %vm66_vm4, %v205_v30, %v63_v37  ;;  %v70_v41 = vmul.f32 %v207_v36, %v69_v38 }
 0x108   :  { %v78_v42 = vmul.f32 %v67_v40, %v44_v13 }
 0x109   :  { %v71_v44 = vmul.f32 0.5, %v70_v41 }
 0x10a   :  { %v84_v45 = vmul.f32 %v199_v39, %v78_v42 }
 0x10b   :  { %v72_v46 = vsub.f32 1.5, %v71_v44 }
 0x10c   :  { %v90_v47 = vadd.f32 %v200_v43, %v84_v45 }
 0x10d   :  { %v73_v48 = vmul.f32 %v207_v36, %v72_v46 }
 0x10e   :  { %190 = vmatmul.msk.f32.vlgmr.msra.gmra.mxu0 %vm28_vm0, %v90_v47 }
 0x10f   :  { %v77_v49 = vsel %vm76_vm7, %v207_v36, %v73_v48 }
 0x110   :  { %v79_v50 = vmul.f32 %v77_v49, %v45_v18 }
 0x112   :  { %v85_v51 = vmul.f32 %v199_v39, %v79_v50 }
 0x114   :  { %v91_v52 = vadd.f32 %v200_v43, %v85_v51 }
 0x116   :  { %191 = vmatmul.msk.f32.vlgmr.msra.gmra.mxu1 %vm28_vm0, %v91_v52 }
 0x18b   :  { %v121_v54 = vpop.f32.mrf.mxu0 }
 0x18c   :  { %v140_v55 = vadd.f32 %v201_v53, %v121_v54 }
 0x18e   :  { %v192_v56 = vmul.f32 -1.702, %v140_v55 }
 0x190   :  { %v146_v57 = vmul.f32 1.442695, %v192_v56 }
 0x192   :  { %208 = vpow2.f32 %v146_v57 }
 0x193   :  { %v124_v58 = vpop.f32.mrf.mxu1 }
 0x194   :  { %v141_v59 = vadd.f32 %v201_v53, %v124_v58 }
 0x196   :  { %v193_v60 = vmul.f32 -1.702, %v141_v59 }
 0x198   :  { %v209_v61 = vpop.eup %208  ;;  %v148_v62 = vmul.f32 1.442695, %v193_v60 }
 0x199   :  { %v150_v63 = vadd.f32 1.0, %v209_v61 }
 0x19a   :  { %210 = vpow2.f32 %v148_v62 }
 0x19b   :  { %212 = vrcp.f32 %v150_v63  ;;  %v163_v5 = vand.u32 2147483648, %v150_v63  ;;  %v161_v7 = vand.u32 2147483647, %v150_v63  ;;  %vm157_vm9 = vweird.f32 %v150_v63 }
 0x19d   :  { %v164_v10 = vor.u32 1.1754944e-38, %v163_v5  ;;  %vm162_vm11 = vcmp.eq.f32.partialorder %v161_v7, 8.507059e+37 }
 0x1a0   :  { %v211_v0 = vpop.eup %210 }
 0x1a1   :  { %v213_v1 = vpop.eup %212  ;;  %v151_v2 = vadd.f32 1.0, %v211_v0 }
 0x1a2   :  { %v153_v3 = vmul.f32 %v213_v1, %v150_v63  ;;  %vm158_vm8 = vweird.f32 %v213_v1 }
 0x1a3   :  { %214 = vrcp.f32 %v151_v2  ;;  %vm159_vm10 = vmor %vm157_vm9, %vm158_vm8  ;;  %v178_v16 = vand.u32 2147483648, %v151_v2  ;;  %v176_v18 = vand.u32 2147483647, %v151_v2  ;;  %vm172_vm13 = vweird.f32 %v151_v2 }
 0x1a4   :  { %v154_v4 = vsub.f32 1.0, %v153_v3 }
 0x1a5   :  { %v179_v20 = vor.u32 1.1754944e-38, %v178_v16  ;;  %vm177_vm15 = vcmp.eq.f32.partialorder %v176_v18, 8.507059e+37 }
 0x1a6   :  { %v155_v6 = vmul.f32 %v213_v1, %v154_v4 }
 0x1a8   :  { %v156_v8 = vadd.f32 %v213_v1, %v155_v6 }
 0x1a9   :  { %v215_v9 = vpop.eup %214 }
 0x1aa   :  { %v160_v11 = vsel %vm159_vm10, %v213_v1, %v156_v8  ;;  %v168_v12 = vmul.f32 %v215_v9, %v151_v2  ;;  %vm173_vm12 = vweird.f32 %v215_v9 }
 0x1ab   :  { %v165_v13 = vsel %vm162_vm11, %v164_v10, %v160_v11  ;;  %vm174_vm14 = vmor %vm172_vm13, %vm173_vm12 }
 0x1ac   :  { %v182_v14 = vmul.f32 %v165_v13, %v140_v55  ;;  %v169_v15 = vsub.f32 1.0, %v168_v12 }
 0x1ae   :  { %184 = vst [vmem:[%s291_s5] sm:$0xff] %v182_v14  ;;  %v170_v17 = vmul.f32 %v215_v9, %v169_v15 }
 0x1b0   :  { %v171_v19 = vadd.f32 %v215_v9, %v170_v17 }
 0x1b2   :  { %v175_v21 = vsel %vm174_vm14, %v215_v9, %v171_v19 }
 0x1b3   :  { %v180_v22 = vsel %vm177_vm15, %v179_v20, %v175_v21 }
 0x1b4   :  { %v183_v23 = vmul.f32 %v180_v22, %v141_v59 }
 0x1b6   :  { %185 = vst [vmem:[%s291_s5 + $0x8] sm:$0xff] %v183_v23 }

</bundles_post_ra>
